<compile_context>
chip_gen: v5e
topology: v5e:2x2
jax: 0.10.0
libtpu: 0.0.40
codegen_flags: <defaults>
</compile_context>

<pallas_src>
import functools

import numpy as np
import jax
import jax.numpy as jnp
from jax.experimental import pallas as pl
from jax.experimental.pallas import tpu as pltpu


_LANE = 128


def _round_up(x, m):
    return ((x + m - 1) // m) * m


def _pad2d(a, rows, cols):
    r, c = a.shape
    return jnp.pad(a, ((0, rows - r), (0, cols - c)))


def _default_softplus_bf16():
    # bf16 EUP path exists on v6e/v7x; on v5e and earlier bf16 transcendental
    # math only inserts converts, so keep f32 there.
    try:
        kind = jax.devices()[0].device_kind.lower()
    except Exception:
        return False
    return ("v6" in kind) or ("v7" in kind)


def _choose_tile_and_rows(n, tn, min_steps=2):
    """Pick a power-of-two batch tile and a bucketed padded row count.

    * tile grows toward `tn` but keeps >= `min_steps` grid steps so the batch
      axis can shard across both TensorCores on v7x.
    * rows are padded to tile * next_power_of_2(steps): varying ray counts hit
      a small bounded set of compiled shapes (no recompile per distinct N).
    """
    n = max(int(n), 1)
    n_p2 = int(pl.next_power_of_2(n))
    tile = 128
    while tile * 2 <= tn and tile * 2 * min_steps <= n_p2:
        tile *= 2
    steps = max(min_steps, int(pl.next_power_of_2(pl.cdiv(n, tile))))
    return tile, tile * steps


# ----------------------------------------------------------------------------
# Pallas kernel: whole SDF MLP fused (Linear + Softplus(beta=100) + skip)
# One grid step processes a (tile, 128) bf16 block of points.  Weights/biases
# are small (<~200 KB), have constant index_maps (DMA'd once) and stay in
# VMEM; activations never leave the chip.
# ----------------------------------------------------------------------------
def _fused_mlp_kernel(x_ref, *refs, skip_flags, real_out, beta=100.0,
                      threshold=20.0, softplus_bf16=False):
    out_ref = refs[-1]
    param_refs = refs[:-1]

    inp = x_ref[...]                        # (tile, in_pad) bf16 (cast in wrapper)
    h = inp
    n_layers = len(skip_flags)
    inv_beta = 1.0 / beta
    idx = 0
    for l in range(n_layers):
        if skip_flags[l]:
            # skip layer: original op is lin(cat([x, inp], 1) / sqrt(2)).
            # The 1/sqrt(2) is folded into wx/wi at init; the concat becomes
            # a split-weight two-matmul accumulate (no lane shuffling).
            wx = param_refs[idx][...]       # (128, out_pad) bf16
            wi = param_refs[idx + 1][...]   # (in_pad, out_pad) bf16
            b = param_refs[idx + 2][...]    # (1, out_pad) f32
            idx += 3
            y = (jnp.dot(h, wx, preferred_element_type=jnp.float32)
                 + jnp.dot(inp, wi, preferred_element_type=jnp.float32)
                 + b)
        else:
            w = param_refs[idx][...]        # (in_pad, out_pad) bf16
            b = param_refs[idx + 1][...]    # (1, out_pad)      f32
            idx += 2
            y = jnp.dot(h, w, preferred_element_type=jnp.float32) + b

        if l < n_layers - 1:
            # torch.nn.Softplus(beta=100): (1/beta)*log1p(exp(beta*x)),
            # linear past beta*x > threshold.  Compute beta*y once; clamp the
            # exp argument so the unselected where-branch never overflows.
            by = beta * y
            lin_mask = by > threshold
            z = jnp.minimum(by, threshold)
            if softplus_bf16:
                # bf16 EUP path (v6e/v7x): ~2x transcendental throughput.
                sp = jnp.log1p(jnp.exp(z.astype(jnp.bfloat16))) * inv_beta
                h = jnp.where(lin_mask, y.astype(jnp.bfloat16), sp)
            else:
                sp = jnp.log1p(jnp.exp(z)) * inv_beta
                h = jnp.where(lin_mask, y, sp).astype(jnp.bfloat16)
        else:
            # Final layer: store only the real output columns (narrow f32
            # store; padded lanes of y are never written to HBM).
            out_ref[...] = y[:, :real_out].astype(out_ref.dtype)


def fused_mlp(inp_bf16, flat_params, *, skip_flags, real_out, tn=2048,
              softplus_bf16=False):
    """inp_bf16: (N, in_pad) bf16 -> (N, real_out) f32."""
    N, in_pad = inp_bf16.shape
    tile, n_rows = _choose_tile_and_rows(N, tn)
    if n_rows != N:
        inp_bf16 = jnp.pad(inp_bf16, ((0, n_rows - N), (0, 0)))

    kernel = functools.partial(
        _fused_mlp_kernel,
        skip_flags=tuple(skip_flags),
        real_out=int(real_out),
        softplus_bf16=bool(softplus_bf16),
    )

    in_specs = [pl.BlockSpec((tile, in_pad), lambda i: (i, 0))]
    for p in flat_params:                   # constant index_map -> DMA'd once
        in_specs.append(pl.BlockSpec(p.shape, lambda i: (0, 0)))

    out = pl.pallas_call(
        kernel,
        out_shape=jax.ShapeDtypeStruct((n_rows, real_out), jnp.float32),
        grid_spec=pltpu.PrefetchScalarGridSpec(
            num_scalar_prefetch=0,
            grid=(n_rows // tile,),
            in_specs=in_specs,
            out_specs=pl.BlockSpec((tile, real_out), lambda i: (i, 0)),
        ),
        compiler_params=pltpu.CompilerParams(
            dimension_semantics=("parallel",)),
    )(inp_bf16, *flat_params)
    return out[:N]


# ----------------------------------------------------------------------------
# Multi-resolution hash-grid encoding (instant-NGP / torch-ngp HashEncoder)
# TODO(synk): the per-level hash-table lookup is a data-dependent gather with
#             no rectangular Pallas tile; it stays in plain JAX (XLA gather).
#             Tables are bf16 to halve gather bytes; accumulation is f32, and
#             the wrapper emits the kernel's input directly as a lane-packed
#             bf16 array (no f32 (N,128) HBM intermediate).
# ----------------------------------------------------------------------------
_PRIMES = (1, 2654435761, 805459861)


def make_hash_tables(key, resolutions, level_dim, hashmap_size):
    tables = []
    for res in resolutions:
        dense = (res + 1) ** 3
        t_size = int(min(hashmap_size, dense))
        key, sub = jax.random.split(key)
        tables.append(jax.random.uniform(
            sub, (t_size, level_dim), minval=-1e-4, maxval=1e-4,
            dtype=jnp.float32).astype(jnp.bfloat16))
    return tables


def hash_grid_encode(x, tables, resolutions, hashmap_size):
    """x: (N, 3), already divided by divide_factor (roughly in [-1, 1])."""
    N = x.shape[0]
    x01 = jnp.clip((x + 1.0) * 0.5, 0.0, 1.0)
    feats = []
    for lvl, res in enumerate(resolutions):
        table = tables[lvl]
        T = table.shape[0]
        pos = x01 * jnp.float32(res - 1)
        pos0 = jnp.floor(pos)
        frac = pos - pos0
        pos0i = pos0.astype(jnp.uint32)
        acc = jnp.zeros((N, table.shape[1]), dtype=jnp.float32)
        dense = (res + 1) ** 3
        for corner in range(8):
            off = np.array([(corner >> 2) & 1, (corner >> 1) & 1, corner & 1])
            c = pos0i + jnp.asarray(off, dtype=jnp.uint32)
            if dense <= hashmap_size:  # dense indexing at coarse levels
                idx = (c[:, 0] * (res + 1) + c[:, 1]) * (res + 1) + c[:, 2]
            else:                      # spatial hash at fine levels
                idx = ((c[:, 0] * jnp.uint32(_PRIMES[0]))
                       ^ (c[:, 1] * jnp.uint32(_PRIMES[1]))
                       ^ (c[:, 2] * jnp.uint32(_PRIMES[2])))
            idx = (idx % jnp.uint32(T)).astype(jnp.int32)
            off_f = jnp.asarray(off, dtype=jnp.float32)
            w = jnp.prod(jnp.where(off_f == 1.0, frac, 1.0 - frac), axis=-1)
            acc = acc + w[:, None] * table[idx].astype(jnp.float32)
        feats.append(acc)
    return jnp.concatenate(feats, axis=-1)


# ----------------------------------------------------------------------------
# ImplicitNetworkGrid in JAX (forward pass)
# ----------------------------------------------------------------------------
class ImplicitNetworkGridJAX:
    def __init__(self, key, feature_vector_size, d_in, d_out, dims,
                 bias=1.0, skip_in=(), inside_outside=False,
                 base_size=16, end_size=256, logmap=14,
                 num_levels=16, level_dim=2, divide_factor=1.5,
                 use_grid_feature=True, tile_n=2048, softplus_bf16=None):
        self.divide_factor = divide_factor
        self.use_grid_feature = use_grid_feature
        self.grid_feature_dim = num_levels * level_dim
        self.skip_in = tuple(skip_in)
        self.hashmap_size = 2 ** logmap
        self.tile_n = tile_n
        self.softplus_bf16 = (_default_softplus_bf16()
                              if softplus_bf16 is None else softplus_bf16)

        dims = [d_in] + list(dims) + [d_out + feature_vector_size]
        dims[0] += self.grid_feature_dim
        self.dims = dims
        self.num_layers = len(dims)
        self.in_pad = _round_up(dims[0], _LANE)
        self.real_out_dim = dims[-1]

        # per-level resolutions (torch-ngp: per_level_scale derived from
        # desired_resolution when provided)
        scale = np.exp((np.log(end_size) - np.log(base_size))
                       / max(num_levels - 1, 1))
        self.resolutions = [int(np.ceil(base_size * scale ** l))
                            for l in range(num_levels)]

        key, tkey = jax.random.split(key)
        self.tables = make_hash_tables(tkey, self.resolutions, level_dim,
                                       self.hashmap_size)

        # Geometric init (weight_norm is identity at init, so effective
        # weights equal the initialized ones).  Weights are stored padded to
        # 128-lane multiples as (in_pad, out_pad) bf16; padding rows/cols are
        # zero so padded lanes never leak into real outputs.
        # TODO(synk): bf16 matmul operands (incl. xyz columns of layer 0)
        #             trade a little precision vs the f32 torch reference.
        flat, skip_flags = [], []
        for l in range(self.num_layers - 1):
            in_dim = dims[l]
            if l + 1 in self.skip_in:
                out_dim = dims[l + 1] - dims[0]
            else:
                out_dim = dims[l + 1]
            key, wkey = jax.random.split(key)
            if l == self.num_layers - 2:
                mean = np.sqrt(np.pi) / np.sqrt(dims[l])
                if inside_outside:
                    mean, b_init = -mean, bias
                else:
                    b_init = -bias
                W = mean + 1e-4 * jax.random.normal(
                    wkey, (out_dim, in_dim), dtype=jnp.float32)
                b = jnp.full((out_dim,), b_init, dtype=jnp.float32)
            else:
                std = np.sqrt(2.0) / np.sqrt(out_dim)
                W = std * jax.random.normal(wkey, (out_dim, in_dim),
                                            dtype=jnp.float32)
                b = jnp.zeros((out_dim,), dtype=jnp.float32)

            out_pad = _round_up(out_dim, _LANE)
            b_p = jnp.zeros((1, out_pad), jnp.float32).at[0, :out_dim].set(b)

            if l in self.skip_in:
                # torch: x = cat([x, inp], 1) / sqrt(2); x = lin(x)
                # -> split W and fold the 1/sqrt(2) into both halves.
                x_dim = dims[l] - dims[0]
                inv = np.float32(1.0 / np.sqrt(2.0))
                Wx = (W[:, :x_dim] * inv).T           # (x_dim,   out_dim)
                Wi = (W[:, x_dim:] * inv).T           # (dims[0], out_dim)
                flat.append(_pad2d(Wx, _round_up(x_dim, _LANE), out_pad)
                            .astype(jnp.bfloat16))
                flat.append(_pad2d(Wi, self.in_pad, out_pad)
                            .astype(jnp.bfloat16))
                flat.append(b_p)
                skip_flags.append(True)
            else:
                flat.append(_pad2d(W.T, _round_up(in_dim, _LANE), out_pad)
                            .astype(jnp.bfloat16))
                flat.append(b_p)
                skip_flags.append(False)

        self.flat_params = flat
        self.skip_flags = tuple(skip_flags)
        self.forward = jax.jit(self._forward)

    def _forward(self, pts):
        # pts: (N, 3)
        pts = pts.astype(jnp.float32)
        if self.use_grid_feature:
            feature = hash_grid_encode(pts / self.divide_factor, self.tables,
                                       self.resolutions, self.hashmap_size)
        else:
            feature = jnp.zeros((pts.shape[0], self.grid_feature_dim),
                                dtype=jnp.float32)
        # Lane-packed bf16 kernel input (no f32 (N,128) HBM intermediate).
        inp = jnp.concatenate([pts, feature], axis=-1).astype(jnp.bfloat16)
        inp = jnp.pad(inp, ((0, 0), (0, self.in_pad - inp.shape[1])))
        out = fused_mlp(inp, self.flat_params,
                        skip_flags=self.skip_flags,
                        real_out=self.real_out_dim,
                        tn=self.tile_n,
                        softplus_bf16=self.softplus_bf16)
        return out                          # (N, d_out + feature_vector_size)


# ----------------------------------------------------------------------------
if __name__ == "__main__":
    key = jax.random.PRNGKey(0)
    key, net_key, pts_key = jax.random.split(key, 3)

    net = ImplicitNetworkGridJAX(
        net_key,
        feature_vector_size=16,
        d_in=3,
        d_out=1,
        dims=[64, 64, 64],
        bias=1.0,
        skip_in=(2,),
        inside_outside=False,
        base_size=16,
        end_size=256,
        logmap=14,
        num_levels=16,
        level_dim=2,
        divide_factor=1.5,
        use_grid_feature=True,
        tile_n=2048,
    )

    N = 256
    pts = jax.random.uniform(pts_key, (N, 3), minval=-1.0, maxval=1.0,
                             dtype=jnp.float32)

    out = net.forward(pts)
    out = jax.block_until_ready(out)

    assert out.shape == (N, 1 + 16), out.shape
    assert bool(jnp.all(jnp.isfinite(out)))
    print("KERNEL_OK")
</pallas_src>

<mosaic_0001>
module attributes {stable_mosaic.version = 11 : i64} {
  func.func @_fused_mlp_kernel(%arg0: i32, %arg1: memref<128x128xbf16, #tpu.memory_space<vmem>>, %arg2: memref<128x128xbf16, #tpu.memory_space<vmem>>, %arg3: memref<1x128xf32, #tpu.memory_space<vmem>>, %arg4: memref<128x128xbf16, #tpu.memory_space<vmem>>, %arg5: memref<1x128xf32, #tpu.memory_space<vmem>>, %arg6: memref<128x128xbf16, #tpu.memory_space<vmem>>, %arg7: memref<128x128xbf16, #tpu.memory_space<vmem>>, %arg8: memref<1x128xf32, #tpu.memory_space<vmem>>, %arg9: memref<128x128xbf16, #tpu.memory_space<vmem>>, %arg10: memref<1x128xf32, #tpu.memory_space<vmem>>, %arg11: memref<128x17xf32, #tpu.memory_space<vmem>>) attributes {dimension_semantics = [#tpu.dimension_semantics<parallel>], iteration_bounds = array<i64: 2>, scalar_prefetch = 0 : i64, scratch_operands = 0 : i64, tpu.core_type = #tpu.core_type<tc>, window_params = [{transform_indices = @transform_0, window_bounds = array<i64: 128, 128>}, {pipeline_mode = #tpu.pipeline_mode<synchronous>, transform_indices = @transform_1, window_bounds = array<i64: 128, 128>}, {pipeline_mode = #tpu.pipeline_mode<synchronous>, transform_indices = @transform_2, window_bounds = array<i64: 1, 128>}, {pipeline_mode = #tpu.pipeline_mode<synchronous>, transform_indices = @transform_3, window_bounds = array<i64: 128, 128>}, {pipeline_mode = #tpu.pipeline_mode<synchronous>, transform_indices = @transform_4, window_bounds = array<i64: 1, 128>}, {pipeline_mode = #tpu.pipeline_mode<synchronous>, transform_indices = @transform_5, window_bounds = array<i64: 128, 128>}, {pipeline_mode = #tpu.pipeline_mode<synchronous>, transform_indices = @transform_6, window_bounds = array<i64: 128, 128>}, {pipeline_mode = #tpu.pipeline_mode<synchronous>, transform_indices = @transform_7, window_bounds = array<i64: 1, 128>}, {pipeline_mode = #tpu.pipeline_mode<synchronous>, transform_indices = @transform_8, window_bounds = array<i64: 128, 128>}, {pipeline_mode = #tpu.pipeline_mode<synchronous>, transform_indices = @transform_9, window_bounds = array<i64: 1, 128>}, {transform_indices = @transform_10, window_bounds = array<i64: 128, 17>}]} {
    %c0 = arith.constant 0 : index
    %c0_0 = arith.constant 0 : index
    %0 = vector.load %arg1[%c0, %c0_0] : memref<128x128xbf16, #tpu.memory_space<vmem>>, vector<128x128xbf16>
    %c0_1 = arith.constant 0 : index
    %c0_2 = arith.constant 0 : index
    %1 = vector.load %arg2[%c0_1, %c0_2] : memref<128x128xbf16, #tpu.memory_space<vmem>>, vector<128x128xbf16>
    %c0_3 = arith.constant 0 : index
    %c0_4 = arith.constant 0 : index
    %2 = vector.load %arg3[%c0_3, %c0_4] : memref<1x128xf32, #tpu.memory_space<vmem>>, vector<1x128xf32>
    %cst = arith.constant dense<0.000000e+00> : vector<128x128xf32>
    %3 = tpu.matmul %0, %1, %cst {dimension_numbers = #tpu.dot_dimension_numbers<[1], [0], [0], [1], [0, 0, 1, 1], [], []>} : vector<128x128xbf16>, vector<128x128xbf16>, vector<128x128xf32> -> vector<128x128xf32>
    %4 = vector.broadcast %2 : vector<1x128xf32> to vector<128x128xf32>
    %5 = arith.addf %3, %4 : vector<128x128xf32>
    %cst_5 = arith.constant 1.000000e+02 : f32
    %6 = vector.broadcast %cst_5 : f32 to vector<128x128xf32>
    %7 = arith.mulf %6, %5 : vector<128x128xf32>
    %cst_6 = arith.constant 2.000000e+01 : f32
    %8 = vector.broadcast %cst_6 : f32 to vector<128x128xf32>
    %9 = arith.cmpf ogt, %7, %8 : vector<128x128xf32>
    %cst_7 = arith.constant 2.000000e+01 : f32
    %10 = vector.broadcast %cst_7 : f32 to vector<128x128xf32>
    %11 = arith.minimumf %7, %10 : vector<128x128xf32>
    %12 = math.exp %11 : vector<128x128xf32>
    %13 = math.log1p %12 : vector<128x128xf32>
    %cst_8 = arith.constant 0.00999999977 : f32
    %14 = vector.broadcast %cst_8 : f32 to vector<128x128xf32>
    %15 = arith.mulf %13, %14 : vector<128x128xf32>
    %16 = arith.select %9, %5, %15 : vector<128x128xi1>, vector<128x128xf32>
    %17 = arith.truncf %16 : vector<128x128xf32> to vector<128x128xbf16>
    %c0_9 = arith.constant 0 : index
    %c0_10 = arith.constant 0 : index
    %18 = vector.load %arg4[%c0_9, %c0_10] : memref<128x128xbf16, #tpu.memory_space<vmem>>, vector<128x128xbf16>
    %c0_11 = arith.constant 0 : index
    %c0_12 = arith.constant 0 : index
    %19 = vector.load %arg5[%c0_11, %c0_12] : memref<1x128xf32, #tpu.memory_space<vmem>>, vector<1x128xf32>
    %cst_13 = arith.constant dense<0.000000e+00> : vector<128x128xf32>
    %20 = tpu.matmul %17, %18, %cst_13 {dimension_numbers = #tpu.dot_dimension_numbers<[1], [0], [0], [1], [0, 0, 1, 1], [], []>} : vector<128x128xbf16>, vector<128x128xbf16>, vector<128x128xf32> -> vector<128x128xf32>
    %21 = vector.broadcast %19 : vector<1x128xf32> to vector<128x128xf32>
    %22 = arith.addf %20, %21 : vector<128x128xf32>
    %cst_14 = arith.constant 1.000000e+02 : f32
    %23 = vector.broadcast %cst_14 : f32 to vector<128x128xf32>
    %24 = arith.mulf %23, %22 : vector<128x128xf32>
    %cst_15 = arith.constant 2.000000e+01 : f32
    %25 = vector.broadcast %cst_15 : f32 to vector<128x128xf32>
    %26 = arith.cmpf ogt, %24, %25 : vector<128x128xf32>
    %cst_16 = arith.constant 2.000000e+01 : f32
    %27 = vector.broadcast %cst_16 : f32 to vector<128x128xf32>
    %28 = arith.minimumf %24, %27 : vector<128x128xf32>
    %29 = math.exp %28 : vector<128x128xf32>
    %30 = math.log1p %29 : vector<128x128xf32>
    %cst_17 = arith.constant 0.00999999977 : f32
    %31 = vector.broadcast %cst_17 : f32 to vector<128x128xf32>
    %32 = arith.mulf %30, %31 : vector<128x128xf32>
    %33 = arith.select %26, %22, %32 : vector<128x128xi1>, vector<128x128xf32>
    %34 = arith.truncf %33 : vector<128x128xf32> to vector<128x128xbf16>
    %c0_18 = arith.constant 0 : index
    %c0_19 = arith.constant 0 : index
    %35 = vector.load %arg6[%c0_18, %c0_19] : memref<128x128xbf16, #tpu.memory_space<vmem>>, vector<128x128xbf16>
    %c0_20 = arith.constant 0 : index
    %c0_21 = arith.constant 0 : index
    %36 = vector.load %arg7[%c0_20, %c0_21] : memref<128x128xbf16, #tpu.memory_space<vmem>>, vector<128x128xbf16>
    %c0_22 = arith.constant 0 : index
    %c0_23 = arith.constant 0 : index
    %37 = vector.load %arg8[%c0_22, %c0_23] : memref<1x128xf32, #tpu.memory_space<vmem>>, vector<1x128xf32>
    %cst_24 = arith.constant dense<0.000000e+00> : vector<128x128xf32>
    %38 = tpu.matmul %34, %35, %cst_24 {dimension_numbers = #tpu.dot_dimension_numbers<[1], [0], [0], [1], [0, 0, 1, 1], [], []>} : vector<128x128xbf16>, vector<128x128xbf16>, vector<128x128xf32> -> vector<128x128xf32>
    %cst_25 = arith.constant dense<0.000000e+00> : vector<128x128xf32>
    %39 = tpu.matmul %0, %36, %cst_25 {dimension_numbers = #tpu.dot_dimension_numbers<[1], [0], [0], [1], [0, 0, 1, 1], [], []>} : vector<128x128xbf16>, vector<128x128xbf16>, vector<128x128xf32> -> vector<128x128xf32>
    %40 = arith.addf %38, %39 : vector<128x128xf32>
    %41 = vector.broadcast %37 : vector<1x128xf32> to vector<128x128xf32>
    %42 = arith.addf %40, %41 : vector<128x128xf32>
    %cst_26 = arith.constant 1.000000e+02 : f32
    %43 = vector.broadcast %cst_26 : f32 to vector<128x128xf32>
    %44 = arith.mulf %43, %42 : vector<128x128xf32>
    %cst_27 = arith.constant 2.000000e+01 : f32
    %45 = vector.broadcast %cst_27 : f32 to vector<128x128xf32>
    %46 = arith.cmpf ogt, %44, %45 : vector<128x128xf32>
    %cst_28 = arith.constant 2.000000e+01 : f32
    %47 = vector.broadcast %cst_28 : f32 to vector<128x128xf32>
    %48 = arith.minimumf %44, %47 : vector<128x128xf32>
    %49 = math.exp %48 : vector<128x128xf32>
    %50 = math.log1p %49 : vector<128x128xf32>
    %cst_29 = arith.constant 0.00999999977 : f32
    %51 = vector.broadcast %cst_29 : f32 to vector<128x128xf32>
    %52 = arith.mulf %50, %51 : vector<128x128xf32>
    %53 = arith.select %46, %42, %52 : vector<128x128xi1>, vector<128x128xf32>
    %54 = arith.truncf %53 : vector<128x128xf32> to vector<128x128xbf16>
    %c0_30 = arith.constant 0 : index
    %c0_31 = arith.constant 0 : index
    %55 = vector.load %arg9[%c0_30, %c0_31] : memref<128x128xbf16, #tpu.memory_space<vmem>>, vector<128x128xbf16>
    %c0_32 = arith.constant 0 : index
    %c0_33 = arith.constant 0 : index
    %56 = vector.load %arg10[%c0_32, %c0_33] : memref<1x128xf32, #tpu.memory_space<vmem>>, vector<1x128xf32>
    %cst_34 = arith.constant dense<0.000000e+00> : vector<128x128xf32>
    %57 = tpu.matmul %54, %55, %cst_34 {dimension_numbers = #tpu.dot_dimension_numbers<[1], [0], [0], [1], [0, 0, 1, 1], [], []>} : vector<128x128xbf16>, vector<128x128xbf16>, vector<128x128xf32> -> vector<128x128xf32>
    %58 = vector.broadcast %56 : vector<1x128xf32> to vector<128x128xf32>
    %59 = arith.addf %57, %58 : vector<128x128xf32>
    %60 = vector.extract_strided_slice %59 {offsets = [0, 0], sizes = [128, 17], strides = [1, 1]} : vector<128x128xf32> to vector<128x17xf32>
    %c0_35 = arith.constant 0 : index
    %c0_36 = arith.constant 0 : index
    %61 = vector.load %arg11[%c0_35, %c0_36] : memref<128x17xf32, #tpu.memory_space<vmem>>, vector<128x17xf32>
    tpu.vector_store %arg11[%c0_35, %c0_36], %60 {strides = array<i32>} : memref<128x17xf32, #tpu.memory_space<vmem>>, vector<128x17xf32>,
    return
  }
  func.func @transform_0(%arg0: i32) -> (i32, i32) {
    %c0_i32 = arith.constant 0 : i32
    %c0_i32_0 = arith.constant 0 : i32
    return %arg0, %c0_i32 : i32, i32
  }
  func.func @transform_1(%arg0: i32) -> (i32, i32) {
    %c0_i32 = arith.constant 0 : i32
    %c0_i32_0 = arith.constant 0 : i32
    %c0_i32_1 = arith.constant 0 : i32
    return %c0_i32, %c0_i32_0 : i32, i32
  }
  func.func @transform_2(%arg0: i32) -> (i32, i32) {
    %c0_i32 = arith.constant 0 : i32
    %c0_i32_0 = arith.constant 0 : i32
    %c0_i32_1 = arith.constant 0 : i32
    return %c0_i32, %c0_i32_0 : i32, i32
  }
  func.func @transform_3(%arg0: i32) -> (i32, i32) {
    %c0_i32 = arith.constant 0 : i32
    %c0_i32_0 = arith.constant 0 : i32
    %c0_i32_1 = arith.constant 0 : i32
    return %c0_i32, %c0_i32_0 : i32, i32
  }
  func.func @transform_4(%arg0: i32) -> (i32, i32) {
    %c0_i32 = arith.constant 0 : i32
    %c0_i32_0 = arith.constant 0 : i32
    %c0_i32_1 = arith.constant 0 : i32
    return %c0_i32, %c0_i32_0 : i32, i32
  }
  func.func @transform_5(%arg0: i32) -> (i32, i32) {
    %c0_i32 = arith.constant 0 : i32
    %c0_i32_0 = arith.constant 0 : i32
    %c0_i32_1 = arith.constant 0 : i32
    return %c0_i32, %c0_i32_0 : i32, i32
  }
  func.func @transform_6(%arg0: i32) -> (i32, i32) {
    %c0_i32 = arith.constant 0 : i32
    %c0_i32_0 = arith.constant 0 : i32
    %c0_i32_1 = arith.constant 0 : i32
    return %c0_i32, %c0_i32_0 : i32, i32
  }
  func.func @transform_7(%arg0: i32) -> (i32, i32) {
    %c0_i32 = arith.constant 0 : i32
    %c0_i32_0 = arith.constant 0 : i32
    %c0_i32_1 = arith.constant 0 : i32
    return %c0_i32, %c0_i32_0 : i32, i32
  }
  func.func @transform_8(%arg0: i32) -> (i32, i32) {
    %c0_i32 = arith.constant 0 : i32
    %c0_i32_0 = arith.constant 0 : i32
    %c0_i32_1 = arith.constant 0 : i32
    return %c0_i32, %c0_i32_0 : i32, i32
  }
  func.func @transform_9(%arg0: i32) -> (i32, i32) {
    %c0_i32 = arith.constant 0 : i32
    %c0_i32_0 = arith.constant 0 : i32
    %c0_i32_1 = arith.constant 0 : i32
    return %c0_i32, %c0_i32_0 : i32, i32
  }
  func.func @transform_10(%arg0: i32) -> (i32, i32) {
    %c0_i32 = arith.constant 0 : i32
    %c0_i32_0 = arith.constant 0 : i32
    return %arg0, %c0_i32 : i32, i32
  }
}

</mosaic_0001>

<bundles_post_ra>
// kernel: _forward.1
= control target key start
LH: loop header
LB: loop body
LE: loop exit
PB: predicated region body
PF: predicated region fallthrough
CT: control target
= control target key end

     0   :  { %s2436_s13 = smov 0   ;;  %s3060_s0 = inlined_call_operand.vmem [shape: bf16[256,128], index: 0, kind: input, shape index: {}]   ;;  %s3061_s1 = inlined_call_operand.vmem [shape: bf16[128,128], index: 1, kind: input, shape index: {}]   ;;  %s3062_s2 = inlined_call_operand.vmem [shape: f32[1,128], index: 2, kind: input, shape index: {}, may-alias: {2,4,7}]   ;;  %s3063_s3 = inlined_call_operand.vmem [shape: bf16[128,128], index: 3, kind: input, shape index: {}]   ;;  %s3064_s4 = inlined_call_operand.vmem [shape: f32[1,128], index: 4, kind: input, shape index: {}, may-alias: {2,4,7}]   ;;  %s3065_s5 = inlined_call_operand.vmem [shape: bf16[128,128], index: 5, kind: input, shape index: {}]   ;;  %s3066_s6 = inlined_call_operand.vmem [shape: bf16[128,128], index: 6, kind: input, shape index: {}]   ;;  %s3067_s7 = inlined_call_operand.vmem [shape: f32[1,128], index: 7, kind: input, shape index: {}, may-alias: {2,4,7}]   ;;  %s3068_s8 = inlined_call_operand.vmem [shape: bf16[128,128], index: 8, kind: input, shape index: {}]   ;;  %s3069_s9 = inlined_call_operand.vmem [shape: f32[1,128], index: 9, kind: input, shape index: {}]   ;;  %s3070_s10 = inlined_call_operand.vmem [shape: f32[256,17], index: 10, kind: output, shape index: {}]  }
   0x1 LB: > { %s1889_s14 = sadd.s32 4294967295, %s2379_s13   ;;  %p1893_p0 = scmp.ge.s32.totalorder %s2379_s13, 1  ;;  %s2379_s13 = sphi %s2436_s13, %s20_s13  }
   0x2   : > { %p313_p1 = scmp.lt.s32.totalorder %s2379_s13, 3 }
   0x4   : > { %p314_p2 = pnand %p1893_p0, %p313_p1 }
   0x5   : > { %s1894_s23 = sshll.u32 (!%p314_p2), %s1889_s14, 4 }
   0x6   : > { %317 = sbr.rel (%p314_p2) target bundleno = 798 (0x31e), region = 60  ;;  %p352_p3 = scmp.lt.s32.totalorder (!%p314_p2), %s1894_s23, 31 }
   0xb   : > { %v2107_v0 = vld [vmem:[%s3061_s1 + $0x38] sm:$0xff]  ;;  %v2106_v1 = vld [vmem:[%s3061_s1 + $0x30] sm:$0xff]  ;;  %v2105_v2 = vld [vmem:[%s3061_s1 + $0x28] sm:$0xff]  ;;  %s3072_s23 = smov (!%p352_p3, %s1894_s23), 31 }
   0xc   : > { %495 = vmatpush.bf16.msra.mxu0 %v2107_v0  ;;  %2140 = vmatpush.bf16.msra.mxu1 %v2107_v0  ;;  %v2104_v3 = vld [vmem:[%s3061_s1 + $0x20] sm:$0xff]  ;;  %v2103_v4 = vld [vmem:[%s3061_s1 + $0x18] sm:$0xff]  ;;  %v2102_v5 = vld [vmem:[%s3061_s1 + $0x10] sm:$0xff]  ;;  %s1895_s30 = sshll.u32 %s3072_s23, 2 }
   0xd   : > { %2141 = vmatpush.bf16.msra.mxu2 %v2107_v0  ;;  %2142 = vmatpush.bf16.msra.mxu3 %v2107_v0  ;;  %v2101_v6 = vld [vmem:[%s3061_s1 + $0x8] sm:$0xff]  ;;  %v2100_v7 = vld [vmem:[%s3061_s1] sm:$0xff]  ;;  %s2474_s16 = scalar_lea.vmem %s3060_s0, %s1895_s30  ;;  %v2115_v16 = vld [vmem:[%s3063_s3 + $0x38] sm:$0xff] }
   0xe   : > { %v2477_v8 = vld [vmem:[%s2474_s16] sm:$0xff]  ;;  %v2480_v9 = vld [vmem:[%s2474_s16 + $0x10] sm:$0xff]  ;;  %v2487_v12 = vld [vmem:[%s2474_s16 + $0x8] sm:$0xff] }
   0xf   : > { %v2096_v10 = vld [vmem:[%s2474_s16 + $0x20] sm:$0xff]  ;;  %v2098_v11 = vld [vmem:[%s2474_s16 + $0x30] sm:$0xff]  ;;  %v2095_v13 = vld [vmem:[%s2474_s16 + $0x18] sm:$0xff] }
  0x10   : > { %496 = vmatpush.bf16.msra.mxu0 %v2106_v1  ;;  %2143 = vmatpush.bf16.msra.mxu1 %v2106_v1  ;;  %v2097_v14 = vld [vmem:[%s2474_s16 + $0x28] sm:$0xff]  ;;  %v2099_v15 = vld [vmem:[%s2474_s16 + $0x38] sm:$0xff]  ;;  %v2114_v17 = vld [vmem:[%s3063_s3 + $0x30] sm:$0xff] }
  0x11   : > { %2144 = vmatpush.bf16.msra.mxu2 %v2106_v1  ;;  %2145 = vmatpush.bf16.msra.mxu3 %v2106_v1  ;;  %v2113_v18 = vld [vmem:[%s3063_s3 + $0x28] sm:$0xff]  ;;  %v2112_v19 = vld [vmem:[%s3063_s3 + $0x20] sm:$0xff]  ;;  %v2111_v20 = vld [vmem:[%s3063_s3 + $0x18] sm:$0xff] }
  0x12   : > { %v2511_v21 = vld [vmem:[%s3062_s2] ss:$0 sm:$0xff]  ;;  %v2110_v22 = vld [vmem:[%s3063_s3 + $0x10] sm:$0xff]  ;;  %v2109_v25 = vld [vmem:[%s3063_s3 + $0x8] sm:$0xff] }
  0x13   : > { %v2108_v28 = vld [vmem:[%s3063_s3] sm:$0xff] }
  0x14   : > { %497 = vmatpush.bf16.msra.mxu0 %v2105_v2  ;;  %2146 = vmatpush.bf16.msra.mxu1 %v2105_v2 }
  0x15   : > { %2147 = vmatpush.bf16.msra.mxu2 %v2105_v2  ;;  %2148 = vmatpush.bf16.msra.mxu3 %v2105_v2 }
  0x18   : > { %498 = vmatpush.bf16.msra.mxu0 %v2104_v3  ;;  %2149 = vmatpush.bf16.msra.mxu1 %v2104_v3 }
  0x19   : > { %2150 = vmatpush.bf16.msra.mxu2 %v2104_v3  ;;  %2151 = vmatpush.bf16.msra.mxu3 %v2104_v3 }
  0x1c   : > { %499 = vmatpush.bf16.msra.mxu0 %v2103_v4  ;;  %2152 = vmatpush.bf16.msra.mxu1 %v2103_v4 }
  0x1d   : > { %2153 = vmatpush.bf16.msra.mxu2 %v2103_v4  ;;  %2154 = vmatpush.bf16.msra.mxu3 %v2103_v4 }
  0x20   : > { %500 = vmatpush.bf16.msra.mxu0 %v2102_v5  ;;  %2155 = vmatpush.bf16.msra.mxu1 %v2102_v5 }
  0x21   : > { %2156 = vmatpush.bf16.msra.mxu2 %v2102_v5  ;;  %2157 = vmatpush.bf16.msra.mxu3 %v2102_v5 }
  0x24   : > { %501 = vmatpush.bf16.msra.mxu0 %v2101_v6  ;;  %2158 = vmatpush.bf16.msra.mxu1 %v2101_v6 }
  0x25   : > { %2159 = vmatpush.bf16.msra.mxu2 %v2101_v6  ;;  %2160 = vmatpush.bf16.msra.mxu3 %v2101_v6 }
  0x28   : > { %502 = vmatpush.bf16.msra.mxu0 %v2100_v7  ;;  %2161 = vmatpush.bf16.msra.mxu1 %v2100_v7 }
  0x29   : > { %2162 = vmatpush.bf16.msra.mxu2 %v2100_v7  ;;  %2163 = vmatpush.bf16.msra.mxu3 %v2100_v7 }
  0x2b   : > { %503 = vmatmul.bf16.vlgmr.msra.gmra.mxu0 %v2477_v8  ;;  %513 = vmatmul.bf16.vlgmr.msra.gmra.mxu1 %v2480_v9 }
  0x2c   : > { %523 = vmatmul.bf16.vlgmr.msra.gmra.mxu2 %v2096_v10  ;;  %533 = vmatmul.bf16.vlgmr.msra.gmra.mxu3 %v2098_v11 }
  0x2d   : > { %876 = vmatpush.bf16.msrb.mxu1 %v2115_v16 }
  0x31   : > { %877 = vmatpush.bf16.msrb.mxu1 %v2114_v17 }
  0x35   : > { %878 = vmatpush.bf16.msrb.mxu1 %v2113_v18 }
  0x39   : > { %879 = vmatpush.bf16.msrb.mxu1 %v2112_v19 }
  0x3b   : > { %508 = vmatmul.bf16.gmra.mxu0 %v2487_v12  ;;  %518 = vmatmul.bf16.gmra.mxu1 %v2095_v13 }
  0x3c   : > { %528 = vmatmul.bf16.gmra.mxu2 %v2097_v14  ;;  %538 = vmatmul.bf16.gmra.mxu3 %v2099_v15 }
  0x3d   : > { %880 = vmatpush.bf16.msrb.mxu1 %v2111_v20 }
  0x41   : > { %881 = vmatpush.bf16.msrb.mxu1 %v2110_v22 }
  0x45   : > { %882 = vmatpush.bf16.msrb.mxu1 %v2109_v25 }
  0x49   : > { %883 = vmatpush.bf16.msrb.mxu1 %v2108_v28 }
  0xa8   : > { %v504_v23 = vpop.f32.mrf.mxu0  ;;  %v514_v27 = vpop.f32.mrf.mxu1 }
  0xa9   : > { %v2517_v24 = vadd.f32 %v2511_v21, %v504_v23  ;;  %v2547_v44 = vadd.f32 %v2511_v21, %v514_v27 }
  0xab   : > { %v2523_v26 = vmul.f32 100.0, %v2517_v24  ;;  %v2556_v54 = vmul.f32 100.0, %v2547_v44 }
  0xad   : > { %v576_v29 = vmin.f32 %v2523_v26, 20.0  ;;  %v580_v62 = vmin.f32 %v2556_v54, 20.0  ;;  %vm560_vm2 = vcmp.gt.f32.partialorder %v2523_v26, 20.0  ;;  %vm564_vm11 = vcmp.gt.f32.partialorder %v2556_v54, 20.0 }
  0xaf   : > { %v592_v30 = vmul.f32 1.442695, %v576_v29  ;;  %v600_v11 = vmul.f32 1.442695, %v580_v62  ;;  %v524_v15 = vpop.f32.mrf.mxu2 }
  0xb0   : > { %v506_v31 = vpop.f32.mrf.mxu0  ;;  %v516_v35 = vpop.f32.mrf.mxu1 }
  0xb1   : > { %2176 = vpow2.f32 %v592_v30  ;;  %v2530_v32 = vadd.f32 %v2511_v21, %v506_v31  ;;  %v2540_v41 = vadd.f32 %v2511_v21, %v516_v35 }
  0xb3   : > { %v2533_v33 = vmul.f32 100.0, %v2530_v32  ;;  %v2550_v45 = vmul.f32 100.0, %v2540_v41 }
  0xb5   : > { %v577_v34 = vmin.f32 %v2533_v33, 20.0  ;;  %v581_v55 = vmin.f32 %v2550_v45, 20.0  ;;  %vm561_vm3 = vcmp.gt.f32.partialorder %v2533_v33, 20.0  ;;  %vm565_vm10 = vcmp.gt.f32.partialorder %v2550_v45, 20.0 }
  0xb7   : > { %v2177_v36 = vpop.eup %2176  ;;  %v594_v37 = vmul.f32 1.442695, %v577_v34  ;;  %v602_v63 = vmul.f32 1.442695, %v581_v55  ;;  %v2583_v55 = vadd.f32 %v2511_v21, %v524_v15 }
  0xb8   : > { %v509_v38 = vpop.f32.mrf.mxu0  ;;  %v624_v39 = vadd.f32 1.0, %v2177_v36  ;;  %v627_v46 = vmul.f32 -0.5, %v2177_v36  ;;  %v519_v49 = vpop.f32.mrf.mxu1  ;;  %v630_v59 = vand.u32 2147483647, %v2177_v36 }
  0xb9   : > { %2178 = vpow2.f32 %v594_v37  ;;  %v2537_v40 = vadd.f32 %v2511_v21, %v509_v38  ;;  %v2568_v19 = vadd.f32 %v2511_v21, %v519_v49 }
  0xba   : > { %2180 = vlog2.f32 %v624_v39  ;;  %v628_v56 = vadd.f32 1.0, %v627_v46  ;;  %vm631_vm0 = vcmp.lt.f32.partialorder %v630_v59, 0.0004427343  ;;  %v526_v39 = vpop.f32.mrf.mxu2 }
  0xbb   : > { %v2543_v42 = vmul.f32 100.0, %v2537_v40  ;;  %v2578_v34 = vmul.f32 100.0, %v2568_v19 }
  0xbc   : > { %v629_v0 = vmul.f32 %v2177_v36, %v628_v56 }
  0xbd   : > { %v578_v43 = vmin.f32 %v2543_v42, 20.0  ;;  %vm562_vm6 = vcmp.gt.f32.partialorder %v2543_v42, 20.0  ;;  %vm566_vm15 = vcmp.gt.f32.partialorder %v2578_v34, 20.0 }
  0xbf   : > { %v2179_v47 = vpop.eup %2178  ;;  %v596_v48 = vmul.f32 1.442695, %v578_v43 }
  0xc0   : > { %v511_v50 = vpop.f32.mrf.mxu0  ;;  %v633_v51 = vadd.f32 1.0, %v2179_v47  ;;  %v2181_v52 = vpop.eup %2180  ;;  %v636_v57 = vmul.f32 -0.5, %v2179_v47  ;;  %v639_v4 = vand.u32 2147483647, %v2179_v47 }
  0xc1   : > { %2182 = vpow2.f32 %v596_v48  ;;  %v2553_v53 = vadd.f32 %v2511_v21, %v511_v50  ;;  %v626_v60 = vmul.f32 0.6931472, %v2181_v52  ;;  %v521_v10 = vpop.f32.mrf.mxu1 }
  0xc2   : > { %2184 = vlog2.f32 %v633_v51  ;;  %v637_v1 = vadd.f32 1.0, %v636_v57  ;;  %vm640_vm1 = vcmp.lt.f32.partialorder %v639_v4, 0.0004427343  ;;  %v2565_v17 = vadd.f32 %v2511_v21, %v521_v10 }
  0xc3   : > { %v2560_v58 = vmul.f32 100.0, %v2553_v53  ;;  %v632_v5 = vsel %vm631_vm0, %v629_v0, %v626_v60 }
  0xc4   : > { %v638_v14 = vmul.f32 %v2179_v47, %v637_v1  ;;  %v768_v16 = vmul.f32 0.01, %v632_v5  ;;  %v2575_v28 = vmul.f32 100.0, %v2565_v17 }
  0xc5   : > { %v579_v61 = vmin.f32 %v2560_v58, 20.0  ;;  %vm563_vm7 = vcmp.gt.f32.partialorder %v2560_v58, 20.0 }
  0xc6   : > { %v784_v25 = vsel %vm560_vm2, %v2517_v24, %v768_v16  ;;  %v583_v24 = vmin.f32 %v2575_v28, 20.0  ;;  %vm567_vm14 = vcmp.gt.f32.partialorder %v2575_v28, 20.0 }
  0xc7   : > { %v2183_v2 = vpop.eup %2182  ;;  %v598_v3 = vmul.f32 1.442695, %v579_v61 }
  0xc8   : > { %v642_v6 = vadd.f32 1.0, %v2183_v2  ;;  %v2185_v7 = vpop.eup %2184  ;;  %v645_v22 = vmul.f32 -0.5, %v2183_v2  ;;  %v648_v37 = vand.u32 2147483647, %v2183_v2  ;;  %v606_v52 = vmul.f32 1.442695, %v583_v24  ;;  %v534_v24 = vpop.f32.mrf.mxu3 }
  0xc9   : > { %2186 = vpow2.f32 %v598_v3  ;;  %v635_v13 = vmul.f32 0.6931472, %v2185_v7  ;;  %v529_v7 = vpop.f32.mrf.mxu2 }
  0xca   : > { %2188 = vpow2.f32 %v602_v63  ;;  %v646_v35 = vadd.f32 1.0, %v645_v22  ;;  %vm649_vm4 = vcmp.lt.f32.partialorder %v648_v37, 0.0004427343  ;;  %v2586_v63 = vadd.f32 %v2511_v21, %v526_v39 }
  0xcb   : > { %v641_v18 = vsel %vm640_vm1, %v638_v14, %v635_v13  ;;  %2190 = vlog2.f32 %v642_v6 }
  0xcc   : > { %v769_v20 = vmul.f32 0.01, %v641_v18  ;;  %2192 = vpow2.f32 %v600_v11  ;;  %v647_v43 = vmul.f32 %v2183_v2, %v646_v35  ;;  %v2591_v2 = vmul.f32 100.0, %v2583_v55 }
  0xcd   : > { %v2596_v13 = vmul.f32 100.0, %v2586_v63 }
  0xce   : > { %v785_v27 = vsel %vm561_vm3, %v2530_v32, %v769_v20  ;;  %v582_v32 = vmin.f32 %v2578_v34, 20.0  ;;  %v584_v16 = vmin.f32 %v2591_v2, 20.0  ;;  %vm568_vm2 = vcmp.gt.f32.partialorder %v2591_v2, 20.0 }
  0xcf   : > { %v2187_v23 = vpop.eup %2186  ;;  %v800_v29 = vpack.c.bf16 %v785_v27, %v784_v25  ;;  %vm569_vm3 = vcmp.gt.f32.partialorder %v2596_v13, 20.0 }
  0xd0   : > { %v651_v30 = vadd.f32 1.0, %v2187_v23  ;;  %v2189_v31 = vpop.eup %2188  ;;  %v654_v36 = vmul.f32 -0.5, %v2187_v23  ;;  %v657_v48 = vand.u32 2147483647, %v2187_v23  ;;  %v604_v56 = vmul.f32 1.442695, %v582_v32 }
  0xd1   : > { %v2191_v26 = vpop.eup %2190  ;;  %884 = vmatmul.bf16.vlgmr.msrb.gmra.mxu1 %v800_v29  ;;  %v669_v47 = vadd.f32 1.0, %v2189_v31  ;;  %v672_v61 = vmul.f32 -0.5, %v2189_v31  ;;  %v675_v11 = vand.u32 2147483647, %v2189_v31  ;;  %v608_v27 = vmul.f32 1.442695, %v584_v16 }
  0xd2   : > { %2194 = vlog2.f32 %v651_v30  ;;  %v644_v33 = vmul.f32 0.6931472, %v2191_v26  ;;  %v2193_v38 = vpop.eup %2192  ;;  %v655_v46 = vadd.f32 1.0, %v654_v36  ;;  %vm658_vm5 = vcmp.lt.f32.partialorder %v657_v48, 0.0004427343  ;;  %v531_v26 = vpop.f32.mrf.mxu2 }
  0xd3   : > { %v660_v50 = vadd.f32 1.0, %v2193_v38  ;;  %2196 = vlog2.f32 %v669_v47  ;;  %v663_v1 = vmul.f32 -0.5, %v2193_v38  ;;  %v673_v5 = vadd.f32 1.0, %v672_v61 }
  0xd4   : > { %v650_v49 = vsel %vm649_vm4, %v647_v43, %v644_v33  ;;  %v656_v59 = vmul.f32 %v2187_v23, %v655_v46  ;;  %v666_v15 = vand.u32 2147483647, %v2193_v38  ;;  %vm676_vm8 = vcmp.lt.f32.partialorder %v675_v11, 0.0004427343 }
  0xd5   : > { %v770_v60 = vmul.f32 0.01, %v650_v49  ;;  %2198 = vlog2.f32 %v660_v50  ;;  %v664_v14 = vadd.f32 1.0, %v663_v1  ;;  %v674_v20 = vmul.f32 %v2189_v31, %v673_v5 }
  0xd6   : > { %2200 = vpow2.f32 %v606_v52  ;;  %vm667_vm9 = vcmp.lt.f32.partialorder %v666_v15, 0.0004427343  ;;  %v2602_v33 = vadd.f32 %v2511_v21, %v529_v7  ;;  %v2620_v15 = vadd.f32 %v2511_v21, %v534_v24 }
  0xd7   : > { %2202 = vpow2.f32 %v604_v56  ;;  %v786_v3 = vsel %vm562_vm6, %v2537_v40, %v770_v60  ;;  %v665_v23 = vmul.f32 %v2193_v38, %v664_v14  ;;  %v2606_v38 = vadd.f32 %v2511_v21, %v531_v26 }
  0xd8   : > { %v2195_v51 = vpop.eup %2194  ;;  %v2610_v45 = vmul.f32 100.0, %v2602_v33  ;;  %v2628_v28 = vmul.f32 100.0, %v2620_v15 }
  0xd9   : > { %v653_v57 = vmul.f32 0.6931472, %v2195_v51  ;;  %v2197_v6 = vpop.eup %2196  ;;  %v2614_v51 = vmul.f32 100.0, %v2606_v38 }
  0xda   : > { %v671_v18 = vmul.f32 0.6931472, %v2197_v6  ;;  %v586_v61 = vmin.f32 %v2610_v45, 20.0  ;;  %v588_v24 = vmin.f32 %v2628_v28, 20.0  ;;  %vm570_vm6 = vcmp.gt.f32.partialorder %v2610_v45, 20.0 }
  0xdb   : > { %v659_v62 = vsel %vm658_vm5, %v656_v59, %v653_v57  ;;  %v2199_v42 = vpop.eup %2198 }
  0xdc   : > { %v771_v0 = vmul.f32 0.01, %v659_v62  ;;  %v2201_v58 = vpop.eup %2200  ;;  %v662_v22 = vmul.f32 0.6931472, %v2199_v42  ;;  %v677_v29 = vsel %vm676_vm8, %v674_v20, %v671_v18  ;;  %v587_v62 = vmin.f32 %v2614_v51, 20.0 }
  0xdd   : > { %v2203_v40 = vpop.eup %2202  ;;  %v687_v25 = vadd.f32 1.0, %v2201_v58  ;;  %v773_v37 = vmul.f32 0.01, %v677_v29  ;;  %v690_v31 = vmul.f32 -0.5, %v2201_v58  ;;  %v693_v49 = vand.u32 2147483647, %v2201_v58 }
  0xde   : > { %v787_v4 = vsel %vm563_vm7, %v2553_v53, %v771_v0  ;;  %v585_v53 = vmin.f32 %v2596_v13, 20.0  ;;  %v678_v30 = vadd.f32 1.0, %v2203_v40  ;;  %v668_v36 = vsel %vm667_vm9, %v665_v23, %v662_v22 }
  0xdf   : > { %v801_v10 = vpack.c.bf16 %v787_v4, %v786_v3  ;;  %2204 = vlog2.f32 %v687_v25  ;;  %v772_v32 = vmul.f32 0.01, %v668_v36  ;;  %v681_v39 = vmul.f32 -0.5, %v2203_v40  ;;  %v536_v3 = vpop.f32.mrf.mxu3 }
  0xe0   : > { %v610_v35 = vmul.f32 1.442695, %v585_v53  ;;  %2206 = vpow2.f32 %v608_v27  ;;  %v789_v43 = vsel %vm565_vm10, %v2540_v41, %v773_v37  ;;  %v691_v46 = vadd.f32 1.0, %v690_v31 }
  0xe1   : > { %889 = vmatmul.bf16.gmra.mxu1 %v801_v10  ;;  %2208 = vlog2.f32 %v678_v30  ;;  %v788_v48 = vsel %vm564_vm11, %v2547_v44, %v772_v32  ;;  %v682_v52 = vadd.f32 1.0, %v681_v39  ;;  %v684_v57 = vand.u32 2147483647, %v2203_v40 }
  0xe2   : > { %2210 = vpow2.f32 %v610_v35  ;;  %v802_v54 = vpack.c.bf16 %v789_v43, %v788_v48  ;;  %v692_v41 = vmul.f32 %v2201_v58, %v691_v46  ;;  %vm694_vm12 = vcmp.lt.f32.partialorder %v693_v49, 0.0004427343 }
  0xe3   : > { %v683_v44 = vmul.f32 %v2203_v40, %v682_v52  ;;  %vm685_vm13 = vcmp.lt.f32.partialorder %v684_v57, 0.0004427343  ;;  %v612_v6 = vmul.f32 1.442695, %v586_v61  ;;  %v614_v7 = vmul.f32 1.442695, %v587_v62 }
  0xe4   : > { %v2624_v16 = vadd.f32 %v2511_v21, %v536_v3  ;;  %vm571_vm7 = vcmp.gt.f32.partialorder %v2614_v51, 20.0  ;;  %vm572_vm10 = vcmp.gt.f32.partialorder %v2628_v28, 20.0 }
  0xe5   : > { %v2205_v47 = vpop.eup %2204 }
  0xe6   : > { %v2207_v50 = vpop.eup %2206  ;;  %v689_v60 = vmul.f32 0.6931472, %v2205_v47  ;;  %v2632_v34 = vmul.f32 100.0, %v2624_v16  ;;  %v616_v47 = vmul.f32 1.442695, %v588_v24 }
  0xe7   : > { %v2209_v56 = vpop.eup %2208  ;;  %v696_v1 = vadd.f32 1.0, %v2207_v50  ;;  %v699_v14 = vmul.f32 -0.5, %v2207_v50  ;;  %v539_v23 = vpop.f32.mrf.mxu3  ;;  %v702_v27 = vand.u32 2147483647, %v2207_v50 }
  0xe8   : > { %v2211_v59 = vpop.eup %2210  ;;  %v680_v0 = vmul.f32 0.6931472, %v2209_v56  ;;  %v695_v5 = vsel %vm694_vm12, %v692_v41, %v689_v60  ;;  %v589_v32 = vmin.f32 %v2632_v34, 20.0  ;;  %v2639_v57 = vadd.f32 %v2511_v21, %v539_v23 }
  0xe9   : > { %v705_v4 = vadd.f32 1.0, %v2211_v59  ;;  %2212 = vlog2.f32 %v696_v1  ;;  %v775_v11 = vmul.f32 0.01, %v695_v5  ;;  %v708_v42 = vmul.f32 -0.5, %v2211_v59 }
  0xea   : > { %v686_v10 = vsel %vm685_vm13, %v683_v44, %v680_v0  ;;  %v700_v40 = vadd.f32 1.0, %v699_v14  ;;  %v711_v29 = vand.u32 2147483647, %v2211_v59  ;;  %vm703_vm0 = vcmp.lt.f32.partialorder %v702_v27, 0.0004427343 }
  0xeb   : > { %2214 = vlog2.f32 %v705_v4  ;;  %v774_v58 = vmul.f32 0.01, %v686_v10  ;;  %v791_v18 = vsel %vm567_vm14, %v2565_v17, %v775_v11  ;;  %v709_v53 = vadd.f32 1.0, %v708_v42 }
  0xec   : > { %2216 = vpow2.f32 %v612_v6  ;;  %v701_v26 = vmul.f32 %v2207_v50, %v700_v40  ;;  %vm712_vm1 = vcmp.lt.f32.partialorder %v711_v29, 0.0004427343  ;;  %v618_v48 = vmul.f32 1.442695, %v589_v32 }
  0xed   : > { %2218 = vpow2.f32 %v614_v7  ;;  %v790_v25 = vsel %vm566_vm15, %v2568_v19, %v774_v58  ;;  %v710_v31 = vmul.f32 %v2211_v59, %v709_v53  ;;  %v2647_v13 = vmul.f32 100.0, %v2639_v57 }
  0xee   : > { %v803_v30 = vpack.c.bf16 %v791_v18, %v790_v25  ;;  %vm573_vm11 = vcmp.gt.f32.partialorder %v2632_v34, 20.0 }
  0xef   : > { %v2213_v20 = vpop.eup %2212  ;;  %v541_v49 = vpop.f32.mrf.mxu3  ;;  %v590_v10 = vmin.f32 %v2647_v13, 20.0  ;;  %vm574_vm14 = vcmp.gt.f32.partialorder %v2647_v13, 20.0  ;;  %v2129_v13 = vld [vmem:[%s3066_s6 + $0x28] sm:$0xff] }
  0xf0   : > { %v698_v17 = vmul.f32 0.6931472, %v2213_v20  ;;  %v2642_v59 = vadd.f32 %v2511_v21, %v541_v49 }
  0xf1   : > { %894 = vmatmul.bf16.gmra.mxu1 %v802_v54  ;;  %v2215_v22 = vpop.eup %2214  ;;  %v620_v20 = vmul.f32 1.442695, %v590_v10  ;;  %v2123_v10 = vld [vmem:[%s3065_s5 + $0x38] sm:$0xff] }
  0xf2   : > { %v2217_v35 = vpop.eup %2216  ;;  %v707_v37 = vmul.f32 0.6931472, %v2215_v22  ;;  %v704_v43 = vsel %vm703_vm0, %v701_v26, %v698_v17  ;;  %v2650_v3 = vmul.f32 100.0, %v2642_v59  ;;  %1367 = vmatpush.bf16.msrb.mxu3 %v2123_v10 }
  0xf3   : > { %v2219_v36 = vpop.eup %2218  ;;  %v714_v19 = vadd.f32 1.0, %v2217_v35  ;;  %v776_v54 = vmul.f32 0.01, %v704_v43  ;;  %v717_v50 = vmul.f32 -0.5, %v2217_v35  ;;  %v720_v44 = vand.u32 2147483647, %v2217_v35 }
  0xf4   : > { %v723_v39 = vadd.f32 1.0, %v2219_v36  ;;  %v713_v46 = vsel %vm712_vm1, %v710_v31, %v707_v37  ;;  %v726_v56 = vmul.f32 -0.5, %v2219_v36  ;;  %v729_v1 = vand.u32 2147483647, %v2219_v36 }
  0xf5   : > { %2220 = vlog2.f32 %v714_v19  ;;  %v777_v52 = vmul.f32 0.01, %v713_v46  ;;  %v792_v60 = vsel %vm568_vm2, %v2583_v55, %v776_v54  ;;  %v718_v62 = vadd.f32 1.0, %v717_v50 }
  0xf6   : > { %2222 = vlog2.f32 %v723_v39  ;;  %v727_v0 = vadd.f32 1.0, %v726_v56  ;;  %vm721_vm4 = vcmp.lt.f32.partialorder %v720_v44, 0.0004427343  ;;  %vm730_vm5 = vcmp.lt.f32.partialorder %v729_v1, 0.0004427343 }
  0xf7   : > { %2224 = vpow2.f32 %v616_v47  ;;  %v793_v41 = vsel %vm569_vm3, %v2586_v63, %v777_v52  ;;  %v719_v55 = vmul.f32 %v2217_v35, %v718_v62  ;;  %v591_v11 = vmin.f32 %v2650_v3, 20.0 }
  0xf8   : > { %2226 = vpow2.f32 %v618_v48  ;;  %v804_v4 = vpack.c.bf16 %v793_v41, %v792_v60  ;;  %v728_v63 = vmul.f32 %v2219_v36, %v727_v0  ;;  %vm575_vm15 = vcmp.gt.f32.partialorder %v2650_v3, 20.0  ;;  %v2122_v3 = vld [vmem:[%s3065_s5 + $0x30] sm:$0xff] }
  0xf9   : > { %v622_v40 = vmul.f32 1.442695, %v591_v11  ;;  %1368 = vmatpush.bf16.msrb.mxu3 %v2122_v3  ;;  %v2127_v11 = vld [vmem:[%s3066_s6 + $0x18] sm:$0xff] }
  0xfb   : > { %v2221_v61 = vpop.eup %2220 }
  0xfc   : > { %v2223_v2 = vpop.eup %2222  ;;  %v716_v6 = vmul.f32 0.6931472, %v2221_v61 }
  0xfd   : > { %v2225_v5 = vpop.eup %2224  ;;  %v725_v7 = vmul.f32 0.6931472, %v2223_v2 }
  0xfe   : > { %v2227_v21 = vpop.eup %2226  ;;  %v732_v14 = vadd.f32 1.0, %v2225_v5  ;;  %v722_v58 = vsel %vm721_vm4, %v719_v55, %v716_v6  ;;  %v735_v23 = vmul.f32 -0.5, %v2225_v5  ;;  %v738_v26 = vand.u32 2147483647, %v2225_v5  ;;  %v2130_v6 = vld [vmem:[%s3066_s6 + $0x30] sm:$0xff] }
  0xff   : > { %v741_v42 = vadd.f32 1.0, %v2227_v21  ;;  %v731_v18 = vsel %vm730_vm5, %v728_v63, %v725_v7  ;;  %v778_v53 = vmul.f32 0.01, %v722_v58  ;;  %v744_v25 = vmul.f32 -0.5, %v2227_v21  ;;  %v2699_v58 = vld [vmem:[%s3064_s4] ss:$0 sm:$0xff] }
 0x100   : > { %2228 = vlog2.f32 %v732_v14  ;;  %v779_v22 = vmul.f32 0.01, %v731_v18  ;;  %v736_v35 = vadd.f32 1.0, %v735_v23  ;;  %v747_v37 = vand.u32 2147483647, %v2227_v21  ;;  %v2120_v14 = vld [vmem:[%s3065_s5 + $0x20] sm:$0xff] }
 0x101   : > { %899 = vmatmul.bf16.gmra.mxu1 %v803_v30  ;;  %2230 = vlog2.f32 %v741_v42  ;;  %v794_v27 = vsel %vm570_vm6, %v2602_v33, %v778_v53  ;;  %v745_v36 = vadd.f32 1.0, %v744_v25  ;;  %vm739_vm8 = vcmp.lt.f32.partialorder %v738_v26, 0.0004427343  ;;  %v2126_v42 = vld [vmem:[%s3066_s6 + $0x10] sm:$0xff]  ;;  %v2125_v53 = vld [vmem:[%s3066_s6 + $0x8] sm:$0xff]  ;;  %v2124_v25 = vld [vmem:[%s3066_s6] sm:$0xff] }
 0x102   : > { %2232 = vpow2.f32 %v620_v20  ;;  %v795_v29 = vsel %vm571_vm7, %v2606_v38, %v779_v22  ;;  %v737_v51 = vmul.f32 %v2225_v5, %v736_v35  ;;  %vm748_vm9 = vcmp.lt.f32.partialorder %v747_v37, 0.0004427343  ;;  %v2118_v23 = vld [vmem:[%s3065_s5 + $0x10] sm:$0xff]  ;;  %v2116_v26 = vld [vmem:[%s3065_s5] sm:$0xff] }
 0x103   : > { %2234 = vpow2.f32 %v622_v40  ;;  %v805_v31 = vpack.c.bf16 %v795_v29, %v794_v27  ;;  %v746_v39 = vmul.f32 %v2227_v21, %v745_v36  ;;  %v2119_v40 = vld [vmem:[%s3065_s5 + $0x18] sm:$0xff]  ;;  %v2117_v36 = vld [vmem:[%s3065_s5 + $0x8] sm:$0xff] }
 0x106   : > { %v2229_v30 = vpop.eup %2228 }
 0x107   : > { %v2231_v17 = vpop.eup %2230  ;;  %v734_v45 = vmul.f32 0.6931472, %v2229_v30 }
 0x108   : > { %v2233_v24 = vpop.eup %2232  ;;  %v743_v19 = vmul.f32 0.6931472, %v2231_v17 }
 0x109   : > { %v2235_v32 = vpop.eup %2234  ;;  %v750_v43 = vadd.f32 1.0, %v2233_v24  ;;  %v740_v46 = vsel %vm739_vm8, %v737_v51, %v734_v45  ;;  %v753_v49 = vmul.f32 -0.5, %v2233_v24  ;;  %v756_v62 = vand.u32 2147483647, %v2233_v24 }
 0x10a   : > { %v759_v33 = vadd.f32 1.0, %v2235_v32  ;;  %v749_v38 = vsel %vm748_vm9, %v746_v39, %v743_v19  ;;  %v780_v47 = vmul.f32 0.01, %v740_v46  ;;  %v762_v54 = vmul.f32 -0.5, %v2235_v32 }
 0x10b   : > { %2236 = vlog2.f32 %v750_v43  ;;  %v781_v48 = vmul.f32 0.01, %v749_v38  ;;  %v754_v60 = vadd.f32 1.0, %v753_v49  ;;  %v765_v0 = vand.u32 2147483647, %v2235_v32 }
 0x10c   : > { %2238 = vlog2.f32 %v759_v33  ;;  %v796_v52 = vsel %vm572_vm10, %v2620_v15, %v780_v47  ;;  %v763_v41 = vadd.f32 1.0, %v762_v54  ;;  %vm757_vm12 = vcmp.lt.f32.partialorder %v756_v62, 0.0004427343  ;;  %v2131_v15 = vld [vmem:[%s3066_s6 + $0x38] sm:$0xff] }
 0x10d   : > { %v797_v50 = vsel %vm573_vm11, %v2624_v16, %v781_v48  ;;  %v755_v1 = vmul.f32 %v2233_v24, %v754_v60  ;;  %vm766_vm13 = vcmp.lt.f32.partialorder %v765_v0, 0.0004427343  ;;  %1270 = vmatpush.bf16.msrb.mxu2 %v2131_v15 }
 0x10e   : > { %v806_v2 = vpack.c.bf16 %v797_v50, %v796_v52  ;;  %v764_v28 = vmul.f32 %v2235_v32, %v763_v41 }
 0x111   : > { %904 = vmatmul.bf16.gmra.mxu1 %v804_v4  ;;  %v2237_v56 = vpop.eup %2236  ;;  %1271 = vmatpush.bf16.msrb.mxu2 %v2130_v6 }
 0x112   : > { %v2239_v61 = vpop.eup %2238  ;;  %v752_v44 = vmul.f32 0.6931472, %v2237_v56 }
 0x113   : > { %v761_v4 = vmul.f32 0.6931472, %v2239_v61 }
 0x114   : > { %v758_v34 = vsel %vm757_vm12, %v755_v1, %v752_v44 }
 0x115   : > { %v767_v5 = vsel %vm766_vm13, %v764_v28, %v761_v4  ;;  %v782_v16 = vmul.f32 0.01, %v758_v34  ;;  %1272 = vmatpush.bf16.msrb.mxu2 %v2129_v13 }
 0x116   : > { %v783_v21 = vmul.f32 0.01, %v767_v5 }
 0x117   : > { %v798_v55 = vsel %vm574_vm14, %v2639_v57, %v782_v16  ;;  %v2128_v57 = vld [vmem:[%s3066_s6 + $0x20] sm:$0xff] }
 0x118   : > { %v799_v7 = vsel %vm575_vm15, %v2642_v59, %v783_v21  ;;  %v2121_v59 = vld [vmem:[%s3065_s5 + $0x28] sm:$0xff] }
 0x119   : > { %v807_v63 = vpack.c.bf16 %v799_v7, %v798_v55  ;;  %1273 = vmatpush.bf16.msrb.mxu2 %v2128_v57  ;;  %1369 = vmatpush.bf16.msrb.mxu3 %v2121_v59 }
 0x11d   : > { %1274 = vmatpush.bf16.msrb.mxu2 %v2127_v11  ;;  %1370 = vmatpush.bf16.msrb.mxu3 %v2120_v14 }
 0x121   : > { %909 = vmatmul.bf16.gmra.mxu1 %v805_v31  ;;  %1275 = vmatpush.bf16.msrb.mxu2 %v2126_v42 }
 0x122   : > { %1371 = vmatpush.bf16.msrb.mxu3 %v2119_v40 }
 0x125   : > { %1276 = vmatpush.bf16.msrb.mxu2 %v2125_v53 }
 0x126   : > { %1372 = vmatpush.bf16.msrb.mxu3 %v2118_v23 }
 0x129   : > { %1277 = vmatpush.bf16.msrb.mxu2 %v2124_v25 }
 0x12a   : > { %1373 = vmatpush.bf16.msrb.mxu3 %v2117_v36 }
 0x12c   : > { %1278 = vmatmul.bf16.vlgmr.msrb.gmra.mxu2 %v2477_v8 }
 0x12e   : > { %1374 = vmatpush.bf16.msrb.mxu3 %v2116_v26 }
 0x131   : > { %914 = vmatmul.bf16.gmra.mxu1 %v806_v2 }
 0x13c   : > { %1283 = vmatmul.bf16.gmra.mxu2 %v2487_v12 }
 0x141   : > { %919 = vmatmul.bf16.gmra.mxu1 %v807_v63 }
 0x14c   : > { %1288 = vmatmul.bf16.gmra.mxu2 %v2480_v9 }
 0x14e   : > { %v885_v18 = vpop.f32.mrf.mxu1 }
 0x14f   : > { %v2702_v20 = vadd.f32 %v2699_v58, %v885_v18 }
 0x151   : > { %v2711_v22 = vmul.f32 100.0, %v2702_v20 }
 0x153   : > { %v957_v27 = vmin.f32 %v2711_v22, 20.0  ;;  %vm941_vm2 = vcmp.gt.f32.partialorder %v2711_v22, 20.0 }
 0x155   : > { %v973_v29 = vmul.f32 1.442695, %v957_v27 }
 0x156   : > { %v887_v30 = vpop.f32.mrf.mxu1 }
 0x157   : > { %2240 = vpow2.f32 %v973_v29  ;;  %v888_v35 = vadd.f32 %v2699_v58, %v887_v30 }
 0x159   : > { %v926_v17 = vmul.f32 100.0, %v888_v35 }
 0x15b   : > { %v958_v37 = vmin.f32 %v926_v17, 20.0  ;;  %vm942_vm3 = vcmp.gt.f32.partialorder %v926_v17, 20.0 }
 0x15d   : > { %v2241_v31 = vpop.eup %2240  ;;  %v975_v24 = vmul.f32 1.442695, %v958_v37 }
 0x15e   : > { %v890_v32 = vpop.f32.mrf.mxu1  ;;  %v1005_v45 = vadd.f32 1.0, %v2241_v31  ;;  %v1008_v39 = vmul.f32 -0.5, %v2241_v31  ;;  %v1011_v52 = vand.u32 2147483647, %v2241_v31 }
 0x15f   : > { %2242 = vpow2.f32 %v975_v24  ;;  %v2729_v51 = vadd.f32 %v2699_v58, %v890_v32 }
 0x160   : > { %2244 = vlog2.f32 %v1005_v45  ;;  %v1009_v49 = vadd.f32 1.0, %v1008_v39  ;;  %vm1012_vm0 = vcmp.lt.f32.partialorder %v1011_v52, 0.0004427343 }
 0x161   : > { %v2732_v19 = vmul.f32 100.0, %v2729_v51 }
 0x162   : > { %v1010_v41 = vmul.f32 %v2241_v31, %v1009_v49 }
 0x163   : > { %v959_v8 = vmin.f32 %v2732_v19, 20.0  ;;  %vm943_vm6 = vcmp.gt.f32.partialorder %v2732_v19, 20.0 }
 0x165   : > { %v2243_v43 = vpop.eup %2242  ;;  %v977_v33 = vmul.f32 1.442695, %v959_v8 }
 0x166   : > { %v2245_v46 = vpop.eup %2244  ;;  %v892_v38 = vpop.f32.mrf.mxu1  ;;  %v1014_v47 = vadd.f32 1.0, %v2243_v43  ;;  %v1017_v54 = vmul.f32 -0.5, %v2243_v43  ;;  %v1020_v62 = vand.u32 2147483647, %v2243_v43 }
 0x167   : > { %2246 = vpow2.f32 %v977_v33  ;;  %v2736_v48 = vadd.f32 %v2699_v58, %v892_v38  ;;  %v1007_v56 = vmul.f32 0.6931472, %v2245_v46 }
 0x168   : > { %2248 = vlog2.f32 %v1014_v47  ;;  %v1018_v61 = vadd.f32 1.0, %v1017_v54  ;;  %vm1021_vm1 = vcmp.lt.f32.partialorder %v1020_v62, 0.0004427343  ;;  %v2368_v62 = vld [vmem:[%s2474_s16 + $0x18] sm:$0xff] }
 0x169   : > { %v2739_v50 = vmul.f32 100.0, %v2736_v48  ;;  %v1013_v44 = vsel %vm1012_vm0, %v1010_v41, %v1007_v56  ;;  %1293 = vmatmul.bf16.gmra.mxu2 %v2368_v62 }
 0x16a   : > { %v1019_v15 = vmul.f32 %v2243_v43, %v1018_v61  ;;  %v1149_v12 = vmul.f32 0.01, %v1013_v44 }
 0x16b   : > { %v960_v60 = vmin.f32 %v2739_v50, 20.0  ;;  %vm944_vm7 = vcmp.gt.f32.partialorder %v2739_v50, 20.0 }
 0x16c   : > { %v1165_v63 = vsel %vm941_vm2, %v2702_v20, %v1149_v12 }
 0x16d   : > { %v2247_v0 = vpop.eup %2246  ;;  %v979_v2 = vmul.f32 1.442695, %v960_v60 }
 0x16e   : > { %v2249_v1 = vpop.eup %2248  ;;  %v895_v4 = vpop.f32.mrf.mxu1  ;;  %v1023_v28 = vadd.f32 1.0, %v2247_v0  ;;  %v1026_v7 = vmul.f32 -0.5, %v2247_v0  ;;  %v1029_v53 = vand.u32 2147483647, %v2247_v0 }
 0x16f   : > { %2250 = vpow2.f32 %v979_v2  ;;  %v2744_v34 = vadd.f32 %v2699_v58, %v895_v4  ;;  %v1016_v5 = vmul.f32 0.6931472, %v2249_v1 }
 0x170   : > { %2252 = vlog2.f32 %v1023_v28  ;;  %v1027_v18 = vadd.f32 1.0, %v1026_v7  ;;  %vm1030_vm4 = vcmp.lt.f32.partialorder %v1029_v53, 0.0004427343 }
 0x171   : > { %v2747_v16 = vmul.f32 100.0, %v2744_v34  ;;  %v1022_v21 = vsel %vm1021_vm1, %v1019_v15, %v1016_v5 }
 0x172   : > { %v1150_v6 = vmul.f32 0.01, %v1022_v21  ;;  %v1028_v25 = vmul.f32 %v2247_v0, %v1027_v18 }
 0x173   : > { %v961_v55 = vmin.f32 %v2747_v16, 20.0  ;;  %vm945_vm10 = vcmp.gt.f32.partialorder %v2747_v16, 20.0 }
 0x174   : > { %v1166_v10 = vsel %vm942_vm3, %v888_v35, %v1150_v6 }
 0x175   : > { %v2251_v13 = vpop.eup %2250  ;;  %v981_v3 = vmul.f32 1.442695, %v961_v55  ;;  %v1181_v57 = vpack.c.bf16 %v1166_v10, %v1165_v63 }
 0x176   : > { %v2253_v59 = vpop.eup %2252  ;;  %v897_v11 = vpop.f32.mrf.mxu1  ;;  %v1032_v14 = vadd.f32 1.0, %v2251_v13  ;;  %v1035_v40 = vmul.f32 -0.5, %v2251_v13  ;;  %v1038_v29 = vand.u32 2147483647, %v2251_v13 }
 0x177   : > { %2254 = vpow2.f32 %v981_v3  ;;  %v2753_v42 = vadd.f32 %v2699_v58, %v897_v11  ;;  %1375 = vmatmul.bf16.vlgmr.msrb.gmra.mxu3 %v1181_v57  ;;  %v1025_v20 = vmul.f32 0.6931472, %v2253_v59 }
 0x178   : > { %2256 = vlog2.f32 %v1032_v14  ;;  %v1036_v27 = vadd.f32 1.0, %v1035_v40  ;;  %vm1039_vm5 = vcmp.lt.f32.partialorder %v1038_v29, 0.0004427343 }
 0x179   : > { %v2756_v22 = vmul.f32 100.0, %v2753_v42  ;;  %v1031_v36 = vsel %vm1030_vm4, %v1028_v25, %v1025_v20 }
 0x17a   : > { %v1037_v32 = vmul.f32 %v2251_v13, %v1036_v27  ;;  %v1151_v9 = vmul.f32 0.01, %v1031_v36 }
 0x17b   : > { %v962_v23 = vmin.f32 %v2756_v22, 20.0  ;;  %vm946_vm11 = vcmp.gt.f32.partialorder %v2756_v22, 20.0 }
 0x17c   : > { %v1167_v46 = vsel %vm943_vm6, %v2729_v51, %v1151_v9 }
 0x17d   : > { %v2255_v30 = vpop.eup %2254  ;;  %v983_v35 = vmul.f32 1.442695, %v962_v23 }
 0x17e   : > { %v2257_v17 = vpop.eup %2256  ;;  %v900_v26 = vpop.f32.mrf.mxu1  ;;  %v1041_v37 = vadd.f32 1.0, %v2255_v30  ;;  %v1044_v33 = vmul.f32 -0.5, %v2255_v30  ;;  %v1047_v61 = vand.u32 2147483647, %v2255_v30 }
 0x17f   : > { %2258 = vpow2.f32 %v983_v35  ;;  %v2761_v31 = vadd.f32 %v2699_v58, %v900_v26  ;;  %v1034_v24 = vmul.f32 0.6931472, %v2257_v17 }
 0x180   : > { %2260 = vlog2.f32 %v1041_v37  ;;  %v1045_v19 = vadd.f32 1.0, %v1044_v33  ;;  %vm1048_vm8 = vcmp.lt.f32.partialorder %v1047_v61, 0.0004427343 }
 0x181   : > { %v2764_v45 = vmul.f32 100.0, %v2761_v31  ;;  %v1040_v8 = vsel %vm1039_vm5, %v1037_v32, %v1034_v24 }
 0x182   : > { %v1152_v39 = vmul.f32 0.01, %v1040_v8  ;;  %v1046_v2 = vmul.f32 %v2255_v30, %v1045_v19  ;;  %v2369_v30 = vld [vmem:[%s2474_s16 + $0x20] sm:$0xff] }
 0x183   : > { %v963_v43 = vmin.f32 %v2764_v45, 20.0  ;;  %1298 = vmatmul.bf16.gmra.mxu2 %v2369_v30  ;;  %vm947_vm14 = vcmp.gt.f32.partialorder %v2764_v45, 20.0 }
 0x184   : > { %v1168_v38 = vsel %vm944_vm7, %v2736_v48, %v1152_v39 }
 0x185   : > { %v2259_v47 = vpop.eup %2258  ;;  %v985_v49 = vmul.f32 1.442695, %v963_v43  ;;  %v1182_v54 = vpack.c.bf16 %v1168_v38, %v1167_v46 }
 0x186   : > { %v2261_v52 = vpop.eup %2260  ;;  %v902_v56 = vpop.f32.mrf.mxu1  ;;  %v1050_v60 = vadd.f32 1.0, %v2259_v47  ;;  %v1053_v50 = vmul.f32 -0.5, %v2259_v47  ;;  %v1056_v1 = vand.u32 2147483647, %v2259_v47 }
 0x187   : > { %2262 = vpow2.f32 %v985_v49  ;;  %v2772_v41 = vadd.f32 %v2699_v58, %v902_v56  ;;  %1380 = vmatmul.bf16.gmra.mxu3 %v1182_v54  ;;  %v1043_v48 = vmul.f32 0.6931472, %v2261_v52 }
 0x188   : > { %2264 = vlog2.f32 %v1050_v60  ;;  %v1054_v44 = vadd.f32 1.0, %v1053_v50  ;;  %vm1057_vm9 = vcmp.lt.f32.partialorder %v1056_v1, 0.0004427343 }
 0x189   : > { %v2775_v51 = vmul.f32 100.0, %v2772_v41  ;;  %v1049_v5 = vsel %vm1048_vm8, %v1046_v2, %v1043_v48 }
 0x18a   : > { %v1055_v7 = vmul.f32 %v2259_v47, %v1054_v44  ;;  %v1153_v63 = vmul.f32 0.01, %v1049_v5 }
 0x18b   : > { %v964_v0 = vmin.f32 %v2775_v51, 20.0  ;;  %vm948_vm15 = vcmp.gt.f32.partialorder %v2775_v51, 20.0 }
 0x18c   : > { %v1169_v11 = vsel %vm945_vm10, %v2744_v34, %v1153_v63 }
 0x18d   : > { %v2263_v4 = vpop.eup %2262  ;;  %v987_v28 = vmul.f32 1.442695, %v964_v0 }
 0x18e   : > { %v2265_v15 = vpop.eup %2264  ;;  %v905_v12 = vpop.f32.mrf.mxu1  ;;  %v1059_v21 = vadd.f32 1.0, %v2263_v4  ;;  %v1062_v59 = vmul.f32 -0.5, %v2263_v4  ;;  %v1065_v29 = vand.u32 2147483647, %v2263_v4 }
 0x18f   : > { %2266 = vpow2.f32 %v987_v28  ;;  %v2780_v6 = vadd.f32 %v2699_v58, %v905_v12  ;;  %v1052_v55 = vmul.f32 0.6931472, %v2265_v15 }
 0x190   : > { %2268 = vlog2.f32 %v1059_v21  ;;  %v1063_v16 = vadd.f32 1.0, %v1062_v59  ;;  %vm1066_vm12 = vcmp.lt.f32.partialorder %v1065_v29, 0.0004427343 }
 0x191   : > { %v2783_v10 = vmul.f32 100.0, %v2780_v6  ;;  %v1058_v13 = vsel %vm1057_vm9, %v1055_v7, %v1052_v55 }
 0x192   : > { %v1154_v3 = vmul.f32 0.01, %v1058_v13  ;;  %v1064_v36 = vmul.f32 %v2263_v4, %v1063_v16  ;;  %v2370_v4 = vld [vmem:[%s2474_s16 + $0x28] sm:$0xff] }
 0x193   : > { %v965_v57 = vmin.f32 %v2783_v10, 20.0  ;;  %1303 = vmatmul.bf16.gmra.mxu2 %v2370_v4  ;;  %vm949_vm2 = vcmp.gt.f32.partialorder %v2783_v10, 20.0 }
 0x194   : > { %v1170_v14 = vsel %vm946_vm11, %v2753_v42, %v1154_v3 }
 0x195   : > { %v2267_v18 = vpop.eup %2266  ;;  %v989_v40 = vmul.f32 1.442695, %v965_v57  ;;  %v1183_v53 = vpack.c.bf16 %v1170_v14, %v1169_v11 }
 0x196   : > { %v2269_v20 = vpop.eup %2268  ;;  %v907_v23 = vpop.f32.mrf.mxu1  ;;  %v1068_v25 = vadd.f32 1.0, %v2267_v18  ;;  %v1071_v22 = vmul.f32 -0.5, %v2267_v18  ;;  %v1074_v26 = vand.u32 2147483647, %v2267_v18 }
 0x197   : > { %2270 = vpow2.f32 %v989_v40  ;;  %v2791_v27 = vadd.f32 %v2699_v58, %v907_v23  ;;  %1385 = vmatmul.bf16.gmra.mxu3 %v1183_v53  ;;  %v1061_v42 = vmul.f32 0.6931472, %v2269_v20 }
 0x198   : > { %2272 = vlog2.f32 %v1068_v25  ;;  %v1072_v17 = vadd.f32 1.0, %v1071_v22  ;;  %vm1075_vm13 = vcmp.lt.f32.partialorder %v1074_v26, 0.0004427343 }
 0x199   : > { %v2794_v34 = vmul.f32 100.0, %v2791_v27  ;;  %v1067_v32 = vsel %vm1066_vm12, %v1064_v36, %v1061_v42 }
 0x19a   : > { %v1073_v46 = vmul.f32 %v2267_v18, %v1072_v17  ;;  %v1155_v38 = vmul.f32 0.01, %v1067_v32 }
 0x19b   : > { %v966_v35 = vmin.f32 %v2794_v34, 20.0  ;;  %vm950_vm3 = vcmp.gt.f32.partialorder %v2794_v34, 20.0 }
 0x19c   : > { %v1171_v60 = vsel %vm947_vm14, %v2761_v31, %v1155_v38 }
 0x19d   : > { %v2271_v37 = vpop.eup %2270  ;;  %v991_v24 = vmul.f32 1.442695, %v966_v35 }
 0x19e   : > { %v2273_v9 = vpop.eup %2272  ;;  %v910_v8 = vpop.f32.mrf.mxu1  ;;  %v1077_v39 = vadd.f32 1.0, %v2271_v37  ;;  %v1080_v56 = vmul.f32 -0.5, %v2271_v37  ;;  %v1083_v1 = vand.u32 2147483647, %v2271_v37 }
 0x19f   : > { %2274 = vpow2.f32 %v991_v24  ;;  %v2799_v43 = vadd.f32 %v2699_v58, %v910_v8  ;;  %v1070_v33 = vmul.f32 0.6931472, %v2273_v9 }
 0x1a0   : > { %2276 = vlog2.f32 %v1077_v39  ;;  %v1081_v45 = vadd.f32 1.0, %v1080_v56  ;;  %vm1084_vm0 = vcmp.lt.f32.partialorder %v1083_v1, 0.0004427343 }
 0x1a1   : > { %v2802_v47 = vmul.f32 100.0, %v2799_v43  ;;  %v1076_v49 = vsel %vm1075_vm13, %v1073_v46, %v1070_v33 }
 0x1a2   : > { %v1156_v54 = vmul.f32 0.01, %v1076_v49  ;;  %v1082_v5 = vmul.f32 %v2271_v37, %v1081_v45  ;;  %v2371_v37 = vld [vmem:[%s2474_s16 + $0x30] sm:$0xff] }
 0x1a3   : > { %v967_v52 = vmin.f32 %v2802_v47, 20.0  ;;  %1308 = vmatmul.bf16.gmra.mxu2 %v2371_v37  ;;  %vm951_vm6 = vcmp.gt.f32.partialorder %v2802_v47, 20.0 }
 0x1a4   : > { %v1172_v19 = vsel %vm948_vm15, %v2772_v41, %v1156_v54 }
 0x1a5   : > { %v2275_v50 = vpop.eup %2274  ;;  %v993_v61 = vmul.f32 1.442695, %v967_v52  ;;  %v1184_v48 = vpack.c.bf16 %v1172_v19, %v1171_v60 }
 0x1a6   : > { %v2277_v62 = vpop.eup %2276  ;;  %v912_v0 = vpop.f32.mrf.mxu1  ;;  %v1086_v2 = vadd.f32 1.0, %v2275_v50  ;;  %v1089_v51 = vmul.f32 -0.5, %v2275_v50  ;;  %v1092_v12 = vand.u32 2147483647, %v2275_v50 }
 0x1a7   : > { %2278 = vpow2.f32 %v993_v61  ;;  %v2810_v44 = vadd.f32 %v2699_v58, %v912_v0  ;;  %1390 = vmatmul.bf16.gmra.mxu3 %v1184_v48  ;;  %v1079_v41 = vmul.f32 0.6931472, %v2277_v62 }
 0x1a8   : > { %2280 = vlog2.f32 %v1086_v2  ;;  %v1090_v15 = vadd.f32 1.0, %v1089_v51  ;;  %vm1093_vm1 = vcmp.lt.f32.partialorder %v1092_v12, 0.0004427343 }
 0x1a9   : > { %v2813_v31 = vmul.f32 100.0, %v2810_v44  ;;  %v1085_v7 = vsel %vm1084_vm0, %v1082_v5, %v1079_v41 }
 0x1aa   : > { %v1091_v11 = vmul.f32 %v2275_v50, %v1090_v15  ;;  %v1157_v14 = vmul.f32 0.01, %v1085_v7 }
 0x1ab   : > { %v968_v28 = vmin.f32 %v2813_v31, 20.0  ;;  %vm952_vm7 = vcmp.gt.f32.partialorder %v2813_v31, 20.0 }
 0x1ac   : > { %v1173_v25 = vsel %vm949_vm2, %v2780_v6, %v1157_v14 }
 0x1ad   : > { %v2279_v21 = vpop.eup %2278  ;;  %v995_v55 = vmul.f32 1.442695, %v968_v28 }
 0x1ae   : > { %v2281_v63 = vpop.eup %2280  ;;  %v915_v13 = vpop.f32.mrf.mxu1  ;;  %v1095_v3 = vadd.f32 1.0, %v2279_v21  ;;  %v1098_v23 = vmul.f32 -0.5, %v2279_v21  ;;  %v1101_v26 = vand.u32 2147483647, %v2279_v21 }
 0x1af   : > { %2282 = vpow2.f32 %v995_v55  ;;  %v2818_v57 = vadd.f32 %v2699_v58, %v915_v13  ;;  %v1088_v59 = vmul.f32 0.6931472, %v2281_v63 }
 0x1b0   : > { %2284 = vlog2.f32 %v1095_v3  ;;  %v1099_v10 = vadd.f32 1.0, %v1098_v23  ;;  %vm1102_vm4 = vcmp.lt.f32.partialorder %v1101_v26, 0.0004427343 }
 0x1b1   : > { %v2821_v18 = vmul.f32 100.0, %v2818_v57  ;;  %v1094_v40 = vsel %vm1093_vm1, %v1091_v11, %v1088_v59 }
 0x1b2   : > { %v1158_v53 = vmul.f32 0.01, %v1094_v40  ;;  %v1100_v32 = vmul.f32 %v2279_v21, %v1099_v10 }
 0x1b3   : > { %v969_v20 = vmin.f32 %v2821_v18, 20.0  ;;  %vm953_vm10 = vcmp.gt.f32.partialorder %v2821_v18, 20.0 }
 0x1b4   : > { %v1174_v16 = vsel %vm950_vm3, %v2791_v27, %v1158_v53 }
 0x1b5   : > { %v2283_v22 = vpop.eup %2282  ;;  %v997_v29 = vmul.f32 1.442695, %v969_v20  ;;  %v1185_v42 = vpack.c.bf16 %v1174_v16, %v1173_v25 }
 0x1b6   : > { %v2285_v30 = vpop.eup %2284  ;;  %v917_v35 = vpop.f32.mrf.mxu1  ;;  %v1104_v36 = vadd.f32 1.0, %v2283_v22  ;;  %v1107_v34 = vmul.f32 -0.5, %v2283_v22  ;;  %v1110_v8 = vand.u32 2147483647, %v2283_v22 }
 0x1b7   : > { %2286 = vpow2.f32 %v997_v29  ;;  %v2829_v17 = vadd.f32 %v2699_v58, %v917_v35  ;;  %1395 = vmatmul.bf16.gmra.mxu3 %v1185_v42  ;;  %v1097_v27 = vmul.f32 0.6931472, %v2285_v30 }
 0x1b8   : > { %2288 = vlog2.f32 %v1104_v36  ;;  %v1108_v9 = vadd.f32 1.0, %v1107_v34  ;;  %vm1111_vm5 = vcmp.lt.f32.partialorder %v1110_v8, 0.0004427343 }
 0x1b9   : > { %v2832_v6 = vmul.f32 100.0, %v2829_v17  ;;  %v1103_v46 = vsel %vm1102_vm4, %v1100_v32, %v1097_v27 }
 0x1ba   : > { %v1109_v60 = vmul.f32 %v2283_v22, %v1108_v9  ;;  %v1159_v19 = vmul.f32 0.01, %v1103_v46 }
 0x1bb   : > { %v970_v24 = vmin.f32 %v2832_v6, 20.0  ;;  %vm954_vm11 = vcmp.gt.f32.partialorder %v2832_v6, 20.0  ;;  %v1279_v6 = vpop.f32.mrf.mxu2 }
 0x1bc   : > { %v1175_v2 = vsel %vm951_vm6, %v2799_v43, %v1159_v19  ;;  %v2372_v43 = vld [vmem:[%s2474_s16 + $0x38] sm:$0xff]  ;;  %s1897_s16 = sshll.u32 %s3072_s23, 3 }
 0x1bd   : > { %v2287_v39 = vpop.eup %2286  ;;  %v999_v33 = vmul.f32 1.442695, %v970_v24  ;;  %1313 = vmatmul.bf16.gmra.mxu2 %v2372_v43  ;;  %s3023_s22 = scalar_lea.vmem %s3070_s10, %s1897_s16 }
 0x1be   : > { %v2289_v38 = vpop.eup %2288  ;;  %v920_v49 = vpop.f32.mrf.mxu1  ;;  %v1113_v54 = vadd.f32 1.0, %v2287_v39  ;;  %v1116_v0 = vmul.f32 -0.5, %v2287_v39  ;;  %v1119_v12 = vand.u32 2147483647, %v2287_v39 }
 0x1bf   : > { %2290 = vpow2.f32 %v999_v33  ;;  %v2837_v52 = vadd.f32 %v2699_v58, %v920_v49  ;;  %v1106_v56 = vmul.f32 0.6931472, %v2289_v38 }
 0x1c0   : > { %2292 = vlog2.f32 %v1113_v54  ;;  %v1117_v47 = vadd.f32 1.0, %v1116_v0  ;;  %vm1120_vm8 = vcmp.lt.f32.partialorder %v1119_v12, 0.0004427343 }
 0x1c1   : > { %v2840_v50 = vmul.f32 100.0, %v2837_v52  ;;  %v1112_v61 = vsel %vm1111_vm5, %v1109_v60, %v1106_v56  ;;  %v2139_v56 = vld [vmem:[%s3068_s8 + $0x38] sm:$0xff]  ;;  %v2138_v60 = vld [vmem:[%s3068_s8 + $0x30] sm:$0xff] }
 0x1c2   : > { %v1160_v48 = vmul.f32 0.01, %v1112_v61  ;;  %v1118_v7 = vmul.f32 %v2287_v39, %v1117_v47  ;;  %1767 = vmatpush.bf16.msrb.mxu0 %v2139_v56  ;;  %v2870_v61 = vld [vmem:[%s3067_s7] ss:$0 sm:$0xff] }
 0x1c3   : > { %v971_v62 = vmin.f32 %v2840_v50, 20.0  ;;  %vm955_vm14 = vcmp.gt.f32.partialorder %v2840_v50, 20.0  ;;  %v1281_v54 = vpop.f32.mrf.mxu2  ;;  %v2137_v50 = vld [vmem:[%s3068_s8 + $0x28] sm:$0xff] }
 0x1c4   : > { %v1176_v45 = vsel %vm952_vm7, %v2810_v44, %v1160_v48 }
 0x1c5   : > { %v2291_v51 = vpop.eup %2290  ;;  %v1001_v1 = vmul.f32 1.442695, %v971_v62  ;;  %v1186_v41 = vpack.c.bf16 %v1176_v45, %v1175_v2  ;;  %v2135_v45 = vld [vmem:[%s3068_s8 + $0x18] sm:$0xff] }
 0x1c6   : > { %v2293_v4 = vpop.eup %2292  ;;  %v922_v28 = vpop.f32.mrf.mxu1  ;;  %v1122_v5 = vadd.f32 1.0, %v2291_v51  ;;  %v1125_v31 = vmul.f32 -0.5, %v2291_v51  ;;  %v1128_v13 = vand.u32 2147483647, %v2291_v51  ;;  %1768 = vmatpush.bf16.msrb.mxu0 %v2138_v60 }
 0x1c7   : > { %2294 = vpow2.f32 %v1001_v1  ;;  %v923_v15 = vadd.f32 %v2699_v58, %v922_v28  ;;  %1400 = vmatmul.bf16.gmra.mxu3 %v1186_v41  ;;  %v1115_v55 = vmul.f32 0.6931472, %v2293_v4  ;;  %v2134_v1 = vld [vmem:[%s3068_s8 + $0x10] sm:$0xff] }
 0x1c8   : > { %2296 = vlog2.f32 %v1122_v5  ;;  %v1126_v63 = vadd.f32 1.0, %v1125_v31  ;;  %vm1129_vm9 = vcmp.lt.f32.partialorder %v1128_v13, 0.0004427343  ;;  %v2133_v31 = vld [vmem:[%s3068_s8 + $0x8] sm:$0xff] }
 0x1c9   : > { %v940_v21 = vmul.f32 100.0, %v923_v15  ;;  %v1121_v11 = vsel %vm1120_vm8, %v1118_v7, %v1115_v55 }
 0x1ca   : > { %v1127_v53 = vmul.f32 %v2291_v51, %v1126_v63  ;;  %v1161_v20 = vmul.f32 0.01, %v1121_v11  ;;  %1769 = vmatpush.bf16.msrb.mxu0 %v2137_v50 }
 0x1cb   : > { %v972_v44 = vmin.f32 %v940_v21, 20.0  ;;  %vm956_vm15 = vcmp.gt.f32.partialorder %v940_v21, 20.0  ;;  %v1284_v19 = vpop.f32.mrf.mxu2  ;;  %v2132_v21 = vld [vmem:[%s3068_s8] sm:$0xff] }
 0x1cc   : > { %v1177_v22 = vsel %vm953_vm10, %v2818_v57, %v1161_v20 }
 0x1cd   : > { %v2295_v3 = vpop.eup %2294  ;;  %v1003_v59 = vmul.f32 1.442695, %v972_v44 }
 0x1ce   : > { %v2297_v14 = vpop.eup %2296  ;;  %v1131_v40 = vadd.f32 1.0, %v2295_v3  ;;  %v1134_v16 = vmul.f32 -0.5, %v2295_v3  ;;  %v1137_v26 = vand.u32 2147483647, %v2295_v3 }
 0x1cf   : > { %2298 = vpow2.f32 %v1003_v59  ;;  %v1124_v58 = vmul.f32 0.6931472, %v2297_v14 }
 0x1d0   : > { %2300 = vlog2.f32 %v1131_v40  ;;  %v1135_v10 = vadd.f32 1.0, %v1134_v16  ;;  %vm1138_vm12 = vcmp.lt.f32.partialorder %v1137_v26, 0.0004427343 }
 0x1d1   : > { %v1130_v23 = vsel %vm1129_vm9, %v1127_v53, %v1124_v58 }
 0x1d2   : > { %v1162_v25 = vmul.f32 0.01, %v1130_v23  ;;  %v1136_v37 = vmul.f32 %v2295_v3, %v1135_v10 }
 0x1d3   : > { %v1286_v62 = vpop.f32.mrf.mxu2 }
 0x1d4   : > { %v1178_v29 = vsel %vm954_vm11, %v2829_v17, %v1162_v25 }
 0x1d5   : > { %v2299_v42 = vpop.eup %2298  ;;  %v1187_v30 = vpack.c.bf16 %v1178_v29, %v1177_v22 }
 0x1d6   : > { %v2301_v35 = vpop.eup %2300  ;;  %v1140_v36 = vadd.f32 1.0, %v2299_v42  ;;  %v1143_v34 = vmul.f32 -0.5, %v2299_v42  ;;  %v1146_v18 = vand.u32 2147483647, %v2299_v42 }
 0x1d7   : > { %1405 = vmatmul.bf16.gmra.mxu3 %v1187_v30  ;;  %v1133_v27 = vmul.f32 0.6931472, %v2301_v35 }
 0x1d8   : > { %2302 = vlog2.f32 %v1140_v36  ;;  %v1144_v24 = vadd.f32 1.0, %v1143_v34  ;;  %vm1147_vm13 = vcmp.lt.f32.partialorder %v1146_v18, 0.0004427343 }
 0x1d9   : > { %v1139_v32 = vsel %vm1138_vm12, %v1136_v37, %v1133_v27 }
 0x1da   : > { %v1145_v8 = vmul.f32 %v2299_v42, %v1144_v24  ;;  %v1163_v17 = vmul.f32 0.01, %v1139_v32 }
 0x1dc   : > { %v1179_v46 = vsel %vm955_vm14, %v2837_v52, %v1163_v17  ;;  %v2136_v52 = vld [vmem:[%s3068_s8 + $0x20] sm:$0xff] }
 0x1dd   : > { %1770 = vmatpush.bf16.msrb.mxu0 %v2136_v52 }
 0x1de   : > { %v2303_v9 = vpop.eup %2302 }
 0x1df   : > { %v1142_v57 = vmul.f32 0.6931472, %v2303_v9 }
 0x1e1   : > { %v1148_v39 = vsel %vm1147_vm13, %v1145_v8, %v1142_v57  ;;  %1771 = vmatpush.bf16.msrb.mxu0 %v2135_v45 }
 0x1e2   : > { %v1164_v33 = vmul.f32 0.01, %v1148_v39 }
 0x1e4   : > { %v1180_v38 = vsel %vm956_vm15, %v923_v15, %v1164_v33  ;;  %v1289_v15 = vpop.f32.mrf.mxu2 }
 0x1e5   : > { %v1188_v49 = vpack.c.bf16 %v1180_v38, %v1179_v46  ;;  %1772 = vmatpush.bf16.msrb.mxu0 %v2134_v1 }
 0x1e7   : > { %1410 = vmatmul.bf16.gmra.mxu3 %v1188_v49 }
 0x1e9   : > { %1773 = vmatpush.bf16.msrb.mxu0 %v2133_v31 }
 0x1ec   : > { %v1291_v59 = vpop.f32.mrf.mxu2 }
 0x1ed   : > { %1774 = vmatpush.bf16.msrb.mxu0 %v2132_v21 }
 0x1f4   : > { %v1294_v10 = vpop.f32.mrf.mxu2 }
 0x1fa   : > { %v1376_v48 = vpop.f32.mrf.mxu3 }
 0x1fb   : > { %v1377_v0 = vadd.f32 %v1376_v48, %v1279_v6 }
 0x1fc   : > { %v1296_v48 = vpop.f32.mrf.mxu2 }
 0x1fd   : > { %v2873_v2 = vadd.f32 %v2870_v61, %v1377_v0 }
 0x1ff   : > { %v2879_v51 = vmul.f32 100.0, %v2873_v2 }
 0x201   : > { %v1467_v41 = vmin.f32 %v2879_v51, 20.0  ;;  %vm1451_vm2 = vcmp.gt.f32.partialorder %v2879_v51, 20.0 }
 0x202   : > { %v1378_v4 = vpop.f32.mrf.mxu3 }
 0x203   : > { %v1483_v28 = vmul.f32 1.442695, %v1467_v41  ;;  %v1379_v5 = vadd.f32 %v1378_v4, %v1281_v54 }
 0x205   : > { %2304 = vpow2.f32 %v1483_v28  ;;  %v2886_v47 = vadd.f32 %v2870_v61, %v1379_v5 }
 0x207   : > { %v1436_v12 = vmul.f32 100.0, %v2886_v47 }
 0x209   : > { %v1468_v55 = vmin.f32 %v1436_v12, 20.0  ;;  %vm1452_vm3 = vcmp.gt.f32.partialorder %v1436_v12, 20.0 }
 0x20a   : > { %v1381_v43 = vpop.f32.mrf.mxu3 }
 0x20b   : > { %v2305_v44 = vpop.eup %2304  ;;  %v1485_v7 = vmul.f32 1.442695, %v1468_v55  ;;  %v1382_v63 = vadd.f32 %v1381_v43, %v1284_v19 }
 0x20c   : > { %v1515_v13 = vadd.f32 1.0, %v2305_v44  ;;  %v1518_v40 = vmul.f32 -0.5, %v2305_v44  ;;  %v1521_v30 = vand.u32 2147483647, %v2305_v44 }
 0x20d   : > { %2306 = vpow2.f32 %v1485_v7  ;;  %v2896_v3 = vadd.f32 %v2870_v61, %v1382_v63 }
 0x20e   : > { %2308 = vlog2.f32 %v1515_v13  ;;  %v1519_v29 = vadd.f32 1.0, %v1518_v40  ;;  %vm1522_vm0 = vcmp.lt.f32.partialorder %v1521_v30, 0.0004427343 }
 0x20f   : > { %v2899_v11 = vmul.f32 100.0, %v2896_v3 }
 0x210   : > { %v1520_v26 = vmul.f32 %v2305_v44, %v1519_v29 }
 0x211   : > { %v1469_v14 = vmin.f32 %v2899_v11, 20.0  ;;  %vm1453_vm6 = vcmp.gt.f32.partialorder %v2899_v11, 20.0 }
 0x212   : > { %v1383_v58 = vpop.f32.mrf.mxu3 }
 0x213   : > { %v2307_v53 = vpop.eup %2306  ;;  %v1487_v20 = vmul.f32 1.442695, %v1469_v14  ;;  %v1384_v23 = vadd.f32 %v1383_v58, %v1286_v62  ;;  %v1299_v14 = vpop.f32.mrf.mxu2 }
 0x214   : > { %v2309_v25 = vpop.eup %2308  ;;  %v1524_v16 = vadd.f32 1.0, %v2307_v53  ;;  %v1527_v42 = vmul.f32 -0.5, %v2307_v53  ;;  %v1530_v24 = vand.u32 2147483647, %v2307_v53 }
 0x215   : > { %2310 = vpow2.f32 %v1487_v20  ;;  %v2903_v22 = vadd.f32 %v2870_v61, %v1384_v23  ;;  %v1517_v36 = vmul.f32 0.6931472, %v2309_v25 }
 0x216   : > { %2312 = vlog2.f32 %v1524_v16  ;;  %v1528_v27 = vadd.f32 1.0, %v1527_v42  ;;  %vm1531_vm1 = vcmp.lt.f32.partialorder %v1530_v24, 0.0004427343 }
 0x217   : > { %v2906_v35 = vmul.f32 100.0, %v2903_v22  ;;  %v1523_v9 = vsel %vm1522_vm0, %v1520_v26, %v1517_v36 }
 0x218   : > { %v1529_v33 = vmul.f32 %v2307_v53, %v1528_v27  ;;  %v1659_v46 = vmul.f32 0.01, %v1523_v9 }
 0x219   : > { %v1470_v34 = vmin.f32 %v2906_v35, 20.0  ;;  %vm1454_vm7 = vcmp.gt.f32.partialorder %v2906_v35, 20.0 }
 0x21a   : > { %v1386_v37 = vpop.f32.mrf.mxu3  ;;  %v1675_v50 = vsel %vm1451_vm2, %v2873_v2, %v1659_v46 }
 0x21b   : > { %v2311_v18 = vpop.eup %2310  ;;  %v1489_v6 = vmul.f32 1.442695, %v1470_v34  ;;  %v1387_v32 = vadd.f32 %v1386_v37, %v1289_v15  ;;  %v1301_v35 = vpop.f32.mrf.mxu2 }
 0x21c   : > { %v2313_v57 = vpop.eup %2312  ;;  %v1533_v8 = vadd.f32 1.0, %v2311_v18  ;;  %v1536_v60 = vmul.f32 -0.5, %v2311_v18  ;;  %v1539_v15 = vand.u32 2147483647, %v2311_v18 }
 0x21d   : > { %2314 = vpow2.f32 %v1489_v6  ;;  %v2910_v17 = vadd.f32 %v2870_v61, %v1387_v32  ;;  %v1526_v39 = vmul.f32 0.6931472, %v2313_v57 }
 0x21e   : > { %2316 = vlog2.f32 %v1533_v8  ;;  %v1537_v51 = vadd.f32 1.0, %v1536_v60  ;;  %vm1540_vm4 = vcmp.lt.f32.partialorder %v1539_v15, 0.0004427343 }
 0x21f   : > { %v2913_v38 = vmul.f32 100.0, %v2910_v17  ;;  %v1532_v49 = vsel %vm1531_vm1, %v1529_v33, %v1526_v39 }
 0x220   : > { %v1660_v54 = vmul.f32 0.01, %v1532_v49  ;;  %v1538_v12 = vmul.f32 %v2311_v18, %v1537_v51 }
 0x221   : > { %v1471_v56 = vmin.f32 %v2913_v38, 20.0  ;;  %vm1455_vm10 = vcmp.gt.f32.partialorder %v2913_v38, 20.0 }
 0x222   : > { %v1388_v19 = vpop.f32.mrf.mxu3  ;;  %v1676_v52 = vsel %vm1452_vm3, %v2886_v47, %v1660_v54 }
 0x223   : > { %v2315_v62 = vpop.eup %2314  ;;  %v1491_v0 = vmul.f32 1.442695, %v1471_v56  ;;  %v1389_v45 = vadd.f32 %v1388_v19, %v1291_v59  ;;  %v1691_v1 = vpack.c.bf16 %v1676_v52, %v1675_v50 }
 0x224   : > { %v2317_v41 = vpop.eup %2316  ;;  %v1542_v4 = vadd.f32 1.0, %v2315_v62  ;;  %v1545_v5 = vmul.f32 -0.5, %v2315_v62  ;;  %v1548_v43 = vand.u32 2147483647, %v2315_v62 }
 0x225   : > { %2318 = vpow2.f32 %v1491_v0  ;;  %v2920_v28 = vadd.f32 %v2870_v61, %v1389_v45  ;;  %1775 = vmatmul.bf16.vlgmr.msrb.gmra.mxu0 %v1691_v1  ;;  %v1535_v47 = vmul.f32 0.6931472, %v2317_v41 }
 0x226   : > { %2320 = vlog2.f32 %v1542_v4  ;;  %v1546_v21 = vadd.f32 1.0, %v1545_v5  ;;  %vm1549_vm5 = vcmp.lt.f32.partialorder %v1548_v43, 0.0004427343  ;;  %v1304_v4 = vpop.f32.mrf.mxu2 }
 0x227   : > { %v2923_v2 = vmul.f32 100.0, %v2920_v28  ;;  %v1541_v13 = vsel %vm1540_vm4, %v1538_v12, %v1535_v47 }
 0x228   : > { %v1547_v20 = vmul.f32 %v2315_v62, %v1546_v21  ;;  %v1661_v23 = vmul.f32 0.01, %v1541_v13 }
 0x229   : > { %v1472_v31 = vmin.f32 %v2923_v2, 20.0  ;;  %vm1456_vm11 = vcmp.gt.f32.partialorder %v2923_v2, 20.0 }
 0x22a   : > { %v1391_v55 = vpop.f32.mrf.mxu3 }
 0x22b   : > { %v2319_v44 = vpop.eup %2318  ;;  %v1493_v7 = vmul.f32 1.442695, %v1472_v31  ;;  %v1392_v63 = vadd.f32 %v1391_v55, %v1294_v10  ;;  %v1677_v10 = vsel %vm1453_vm6, %v2896_v3, %v1661_v23 }
 0x22c   : > { %v2321_v59 = vpop.eup %2320  ;;  %v1551_v40 = vadd.f32 1.0, %v2319_v44  ;;  %v1554_v30 = vmul.f32 -0.5, %v2319_v44  ;;  %v1557_v57 = vand.u32 2147483647, %v2319_v44 }
 0x22d   : > { %2322 = vpow2.f32 %v1493_v7  ;;  %v2927_v58 = vadd.f32 %v2870_v61, %v1392_v63  ;;  %v1544_v53 = vmul.f32 0.6931472, %v2321_v59 }
 0x22e   : > { %2324 = vlog2.f32 %v1551_v40  ;;  %v1555_v11 = vadd.f32 1.0, %v1554_v30  ;;  %vm1558_vm8 = vcmp.lt.f32.partialorder %v1557_v57, 0.0004427343 }
 0x22f   : > { %v2930_v25 = vmul.f32 100.0, %v2927_v58  ;;  %v1550_v16 = vsel %vm1549_vm5, %v1547_v20, %v1544_v53  ;;  %v1306_v20 = vpop.f32.mrf.mxu2 }
 0x230   : > { %v1662_v29 = vmul.f32 0.01, %v1550_v16  ;;  %v1556_v39 = vmul.f32 %v2319_v44, %v1555_v11 }
 0x231   : > { %v1473_v42 = vmin.f32 %v2930_v25, 20.0  ;;  %vm1457_vm14 = vcmp.gt.f32.partialorder %v2930_v25, 20.0 }
 0x232   : > { %v1393_v36 = vpop.f32.mrf.mxu3  ;;  %v1678_v34 = vsel %vm1454_vm7, %v2903_v22, %v1662_v29 }
 0x233   : > { %v2323_v26 = vpop.eup %2322  ;;  %v1495_v27 = vmul.f32 1.442695, %v1473_v42  ;;  %v1394_v37 = vadd.f32 %v1393_v36, %v1296_v48  ;;  %v1692_v24 = vpack.c.bf16 %v1678_v34, %v1677_v10 }
 0x234   : > { %v2325_v18 = vpop.eup %2324  ;;  %v1560_v6 = vadd.f32 1.0, %v2323_v26  ;;  %v1563_v9 = vmul.f32 -0.5, %v2323_v26  ;;  %v1566_v49 = vand.u32 2147483647, %v2323_v26 }
 0x235   : > { %2326 = vpow2.f32 %v1495_v27  ;;  %v2938_v32 = vadd.f32 %v2870_v61, %v1394_v37  ;;  %1780 = vmatmul.bf16.gmra.mxu0 %v1692_v24  ;;  %v1553_v22 = vmul.f32 0.6931472, %v2325_v18 }
 0x236   : > { %2328 = vlog2.f32 %v1560_v6  ;;  %v1564_v33 = vadd.f32 1.0, %v1563_v9  ;;  %vm1567_vm9 = vcmp.lt.f32.partialorder %v1566_v49, 0.0004427343 }
 0x237   : > { %v2941_v3 = vmul.f32 100.0, %v2938_v32  ;;  %v1559_v19 = vsel %vm1558_vm8, %v1556_v39, %v1553_v22 }
 0x238   : > { %v1565_v0 = vmul.f32 %v2323_v26, %v1564_v33  ;;  %v1663_v45 = vmul.f32 0.01, %v1559_v19 }
 0x239   : > { %v1474_v8 = vmin.f32 %v2941_v3, 20.0  ;;  %vm1458_vm15 = vcmp.gt.f32.partialorder %v2941_v3, 20.0 }
 0x23a   : > { %v1396_v46 = vpop.f32.mrf.mxu3  ;;  %v1679_v31 = vsel %vm1455_vm10, %v2910_v17, %v1663_v45 }
 0x23b   : > { %v2327_v54 = vpop.eup %2326  ;;  %v1497_v56 = vmul.f32 1.442695, %v1474_v8  ;;  %v1397_v60 = vadd.f32 %v1396_v46, %v1299_v14 }
 0x23c   : > { %v2329_v50 = vpop.eup %2328  ;;  %v1569_v52 = vadd.f32 1.0, %v2327_v54  ;;  %v1572_v15 = vmul.f32 -0.5, %v2327_v54  ;;  %v1575_v2 = vand.u32 2147483647, %v2327_v54 }
 0x23d   : > { %2330 = vpow2.f32 %v1497_v56  ;;  %v2945_v48 = vadd.f32 %v2870_v61, %v1397_v60  ;;  %v1562_v62 = vmul.f32 0.6931472, %v2329_v50  ;;  %v1309_v56 = vpop.f32.mrf.mxu2 }
 0x23e   : > { %2332 = vlog2.f32 %v1569_v52  ;;  %v1573_v38 = vadd.f32 1.0, %v1572_v15  ;;  %vm1576_vm12 = vcmp.lt.f32.partialorder %v1575_v2, 0.0004427343 }
 0x23f   : > { %v2948_v1 = vmul.f32 100.0, %v2945_v48  ;;  %v1568_v41 = vsel %vm1567_vm9, %v1565_v0, %v1562_v62 }
 0x240   : > { %v1664_v51 = vmul.f32 0.01, %v1568_v41  ;;  %v1574_v40 = vmul.f32 %v2327_v54, %v1573_v38 }
 0x241   : > { %v1475_v5 = vmin.f32 %v2948_v1, 20.0  ;;  %vm1459_vm2 = vcmp.gt.f32.partialorder %v2948_v1, 20.0 }
 0x242   : > { %v1398_v47 = vpop.f32.mrf.mxu3  ;;  %v1680_v12 = vsel %vm1456_vm11, %v2920_v28, %v1664_v51 }
 0x243   : > { %v2331_v21 = vpop.eup %2330  ;;  %v1499_v55 = vmul.f32 1.442695, %v1475_v5  ;;  %v1399_v43 = vadd.f32 %v1398_v47, %v1301_v35  ;;  %v1693_v44 = vpack.c.bf16 %v1680_v12, %v1679_v31 }
 0x244   : > { %v2333_v7 = vpop.eup %2332  ;;  %v1578_v63 = vadd.f32 1.0, %v2331_v21  ;;  %v1581_v59 = vmul.f32 -0.5, %v2331_v21  ;;  %v1584_v16 = vand.u32 2147483647, %v2331_v21 }
 0x245   : > { %2334 = vpow2.f32 %v1499_v55  ;;  %v2956_v13 = vadd.f32 %v2870_v61, %v1399_v43  ;;  %1785 = vmatmul.bf16.gmra.mxu0 %v1693_v44  ;;  %v1571_v17 = vmul.f32 0.6931472, %v2333_v7  ;;  %v1311_v43 = vpop.f32.mrf.mxu2 }
 0x246   : > { %2336 = vlog2.f32 %v1578_v63  ;;  %v1582_v53 = vadd.f32 1.0, %v1581_v59  ;;  %vm1585_vm13 = vcmp.lt.f32.partialorder %v1584_v16, 0.0004427343 }
 0x247   : > { %v2959_v14 = vmul.f32 100.0, %v2956_v13  ;;  %v1577_v36 = vsel %vm1576_vm12, %v1574_v40, %v1571_v17 }
 0x248   : > { %v1583_v37 = vmul.f32 %v2331_v21, %v1582_v53  ;;  %v1665_v24 = vmul.f32 0.01, %v1577_v36 }
 0x249   : > { %v1476_v28 = vmin.f32 %v2959_v14, 20.0  ;;  %vm1460_vm3 = vcmp.gt.f32.partialorder %v2959_v14, 20.0 }
 0x24a   : > { %v1401_v23 = vpop.f32.mrf.mxu3  ;;  %v1681_v22 = vsel %vm1457_vm14, %v2927_v58, %v1665_v24 }
 0x24b   : > { %v2335_v29 = vpop.eup %2334  ;;  %v1501_v42 = vmul.f32 1.442695, %v1476_v28  ;;  %v1402_v30 = vadd.f32 %v1401_v23, %v1304_v4 }
 0x24c   : > { %v2337_v10 = vpop.eup %2336  ;;  %v1587_v34 = vadd.f32 1.0, %v2335_v29  ;;  %v1590_v35 = vmul.f32 -0.5, %v2335_v29  ;;  %v1593_v50 = vand.u32 2147483647, %v2335_v29 }
 0x24d   : > { %2338 = vpow2.f32 %v1501_v42  ;;  %v2963_v26 = vadd.f32 %v2870_v61, %v1402_v30  ;;  %v1580_v27 = vmul.f32 0.6931472, %v2337_v10 }
 0x24e   : > { %2340 = vlog2.f32 %v1587_v34  ;;  %v1591_v25 = vadd.f32 1.0, %v1590_v35  ;;  %vm1594_vm0 = vcmp.lt.f32.partialorder %v1593_v50, 0.0004427343 }
 0x24f   : > { %v2966_v18 = vmul.f32 100.0, %v2963_v26  ;;  %v1586_v6 = vsel %vm1585_vm13, %v1583_v37, %v1580_v27 }
 0x250   : > { %v1666_v11 = vmul.f32 0.01, %v1586_v6  ;;  %v1592_v62 = vmul.f32 %v2335_v29, %v1591_v25 }
 0x251   : > { %v1477_v9 = vmin.f32 %v2966_v18, 20.0  ;;  %vm1461_vm6 = vcmp.gt.f32.partialorder %v2966_v18, 20.0 }
 0x252   : > { %v1403_v57 = vpop.f32.mrf.mxu3  ;;  %v1682_v8 = vsel %vm1458_vm15, %v2938_v32, %v1666_v11 }
 0x253   : > { %v2339_v39 = vpop.eup %2338  ;;  %v1503_v33 = vmul.f32 1.442695, %v1477_v9  ;;  %v1404_v46 = vadd.f32 %v1403_v57, %v1306_v20  ;;  %v1694_v49 = vpack.c.bf16 %v1682_v8, %v1681_v22 }
 0x254   : > { %v2341_v54 = vpop.eup %2340  ;;  %v1596_v60 = vadd.f32 1.0, %v2339_v39  ;;  %v1599_v3 = vmul.f32 -0.5, %v2339_v39  ;;  %v1602_v41 = vand.u32 2147483647, %v2339_v39 }
 0x255   : > { %2342 = vpow2.f32 %v1503_v33  ;;  %v2974_v19 = vadd.f32 %v2870_v61, %v1404_v46  ;;  %1790 = vmatmul.bf16.gmra.mxu0 %v1694_v49  ;;  %v1589_v32 = vmul.f32 0.6931472, %v2341_v54 }
 0x256   : > { %2344 = vlog2.f32 %v1596_v60  ;;  %v1600_v0 = vadd.f32 1.0, %v1599_v3  ;;  %vm1603_vm1 = vcmp.lt.f32.partialorder %v1602_v41, 0.0004427343 }
 0x257   : > { %v2977_v58 = vmul.f32 100.0, %v2974_v19  ;;  %v1595_v15 = vsel %vm1594_vm0, %v1592_v62, %v1589_v32  ;;  %vm1816_vm0 = vcmask 138240  }
 0x258   : > { %v1601_v55 = vmul.f32 %v2339_v39, %v1600_v0  ;;  %v1667_v44 = vmul.f32 0.01, %v1595_v15 }
 0x259   : > { %v1478_v52 = vmin.f32 %v2977_v58, 20.0  ;;  %vm1462_vm7 = vcmp.gt.f32.partialorder %v2977_v58, 20.0 }
 0x25a   : > { %v1406_v45 = vpop.f32.mrf.mxu3  ;;  %v1683_v28 = vsel %vm1459_vm2, %v2945_v48, %v1667_v44 }
 0x25b   : > { %v2343_v4 = vpop.eup %2342  ;;  %v1505_v51 = vmul.f32 1.442695, %v1478_v52  ;;  %v1407_v5 = vadd.f32 %v1406_v45, %v1309_v56 }
 0x25c   : > { %v2345_v47 = vpop.eup %2344  ;;  %v1605_v31 = vadd.f32 1.0, %v2343_v4  ;;  %v1608_v2 = vmul.f32 -0.5, %v2343_v4  ;;  %v1611_v14 = vand.u32 2147483647, %v2343_v4 }
 0x25d   : > { %2346 = vpow2.f32 %v1505_v51  ;;  %v2981_v12 = vadd.f32 %v2870_v61, %v1407_v5  ;;  %v1598_v21 = vmul.f32 0.6931472, %v2345_v47 }
 0x25e   : > { %2348 = vlog2.f32 %v1605_v31  ;;  %v1609_v1 = vadd.f32 1.0, %v1608_v2  ;;  %vm1612_vm4 = vcmp.lt.f32.partialorder %v1611_v14, 0.0004427343 }
 0x25f   : > { %v2984_v7 = vmul.f32 100.0, %v2981_v12  ;;  %v1604_v63 = vsel %vm1603_vm1, %v1601_v55, %v1598_v21 }
 0x260   : > { %v1668_v38 = vmul.f32 0.01, %v1604_v63  ;;  %v1610_v27 = vmul.f32 %v2343_v4, %v1609_v1 }
 0x261   : > { %v1479_v59 = vmin.f32 %v2984_v7, 20.0  ;;  %vm1463_vm10 = vcmp.gt.f32.partialorder %v2984_v7, 20.0 }
 0x262   : > { %v1408_v17 = vpop.f32.mrf.mxu3  ;;  %v1684_v40 = vsel %vm1460_vm3, %v2956_v13, %v1668_v38  ;;  %v1314_v13 = vpop.f32.mrf.mxu2 }
 0x263   : > { %v2347_v53 = vpop.eup %2346  ;;  %v1507_v20 = vmul.f32 1.442695, %v1479_v59  ;;  %v1409_v23 = vadd.f32 %v1408_v17, %v1311_v43  ;;  %v1695_v16 = vpack.c.bf16 %v1684_v40, %v1683_v28 }
 0x264   : > { %v2349_v29 = vpop.eup %2348  ;;  %v1614_v42 = vadd.f32 1.0, %v2347_v53  ;;  %v1617_v36 = vmul.f32 -0.5, %v2347_v53  ;;  %v1620_v6 = vand.u32 2147483647, %v2347_v53 }
 0x265   : > { %2350 = vpow2.f32 %v1507_v20  ;;  %v2992_v30 = vadd.f32 %v2870_v61, %v1409_v23  ;;  %1795 = vmatmul.bf16.gmra.mxu0 %v1695_v16  ;;  %v1607_v48 = vmul.f32 0.6931472, %v2349_v29 }
 0x266   : > { %2352 = vlog2.f32 %v1614_v42  ;;  %v1618_v37 = vadd.f32 1.0, %v1617_v36  ;;  %vm1621_vm5 = vcmp.lt.f32.partialorder %v1620_v6, 0.0004427343 }
 0x267   : > { %v2995_v10 = vmul.f32 100.0, %v2992_v30  ;;  %v1613_v57 = vsel %vm1612_vm4, %v1610_v27, %v1607_v48 }
 0x268   : > { %v1619_v46 = vmul.f32 %v2347_v53, %v1618_v37  ;;  %v1669_v49 = vmul.f32 0.01, %v1613_v57 }
 0x269   : > { %v1480_v34 = vmin.f32 %v2995_v10, 20.0  ;;  %vm1464_vm11 = vcmp.gt.f32.partialorder %v2995_v10, 20.0 }
 0x26a   : > { %v1411_v24 = vpop.f32.mrf.mxu3  ;;  %v1316_v50 = vpop.f32.mrf.mxu2  ;;  %v1685_v52 = vsel %vm1461_vm6, %v2963_v26, %v1669_v49 }
 0x26b   : > { %v2351_v11 = vpop.eup %2350  ;;  %v1509_v9 = vmul.f32 1.442695, %v1480_v34  ;;  %v1412_v35 = vadd.f32 %v1411_v24, %v1314_v13 }
 0x26c   : > { %v2353_v22 = vpop.eup %2352  ;;  %v1623_v8 = vadd.f32 1.0, %v2351_v11  ;;  %v1626_v3 = vmul.f32 -0.5, %v2351_v11  ;;  %v1629_v58 = vand.u32 2147483647, %v2351_v11 }
 0x26d   : > { %2354 = vpow2.f32 %v1509_v9  ;;  %v2999_v39 = vadd.f32 %v2870_v61, %v1412_v35  ;;  %v1616_v33 = vmul.f32 0.6931472, %v2353_v22 }
 0x26e   : > { %2356 = vlog2.f32 %v1623_v8  ;;  %v1627_v18 = vadd.f32 1.0, %v1626_v3  ;;  %vm1630_vm8 = vcmp.lt.f32.partialorder %v1629_v58, 0.0004427343  ;;  %v2175_v8 = vld [vmem:[%s3069_s9] ss:$0 sm:$0xff] }
 0x26f   : > { %v3002_v54 = vmul.f32 100.0, %v2999_v39  ;;  %v1622_v56 = vsel %vm1621_vm5, %v1619_v46, %v1616_v33 }
 0x270   : > { %v1670_v60 = vmul.f32 0.01, %v1622_v56  ;;  %v1628_v26 = vmul.f32 %v2351_v11, %v1627_v18 }
 0x271   : > { %v1481_v25 = vmin.f32 %v3002_v54, 20.0  ;;  %vm1465_vm14 = vcmp.gt.f32.partialorder %v3002_v54, 20.0 }
 0x272   : > { %v1413_v32 = vpop.f32.mrf.mxu3  ;;  %v1686_v62 = vsel %vm1462_vm7, %v2974_v19, %v1670_v60 }
 0x273   : > { %v2355_v0 = vpop.eup %2354  ;;  %v1511_v45 = vmul.f32 1.442695, %v1481_v25  ;;  %v1414_v41 = vadd.f32 %v1413_v32, %v1316_v50  ;;  %v1696_v4 = vpack.c.bf16 %v1686_v62, %v1685_v52 }
 0x274   : > { %v2357_v51 = vpop.eup %2356  ;;  %v1632_v5 = vadd.f32 1.0, %v2355_v0  ;;  %v1635_v47 = vmul.f32 -0.5, %v2355_v0  ;;  %v1638_v19 = vand.u32 2147483647, %v2355_v0 }
 0x275   : > { %2358 = vpow2.f32 %v1511_v45  ;;  %v1434_v15 = vadd.f32 %v2870_v61, %v1414_v41  ;;  %1800 = vmatmul.bf16.gmra.mxu0 %v1696_v4  ;;  %v1625_v21 = vmul.f32 0.6931472, %v2357_v51 }
 0x276   : > { %2360 = vlog2.f32 %v1632_v5  ;;  %v1636_v43 = vadd.f32 1.0, %v1635_v47  ;;  %vm1639_vm9 = vcmp.lt.f32.partialorder %v1638_v19, 0.0004427343 }
 0x277   : > { %v1450_v31 = vmul.f32 100.0, %v1434_v15  ;;  %v1631_v38 = vsel %vm1630_vm8, %v1628_v26, %v1625_v21 }
 0x278   : > { %v1637_v61 = vmul.f32 %v2355_v0, %v1636_v43  ;;  %v1671_v28 = vmul.f32 0.01, %v1631_v38 }
 0x279   : > { %v1482_v55 = vmin.f32 %v1450_v31, 20.0  ;;  %vm1466_vm15 = vcmp.gt.f32.partialorder %v1450_v31, 20.0 }
 0x27a   : > { %v1687_v23 = vsel %vm1463_vm10, %v2981_v12, %v1671_v28 }
 0x27b   : > { %v2359_v44 = vpop.eup %2358  ;;  %v1513_v63 = vmul.f32 1.442695, %v1482_v55 }
 0x27c   : > { %v2361_v59 = vpop.eup %2360  ;;  %v1641_v2 = vadd.f32 1.0, %v2359_v44  ;;  %v1644_v20 = vmul.f32 -0.5, %v2359_v44  ;;  %v1647_v13 = vand.u32 2147483647, %v2359_v44 }
 0x27d   : > { %2362 = vpow2.f32 %v1513_v63  ;;  %v1634_v17 = vmul.f32 0.6931472, %v2361_v59 }
 0x27e   : > { %2364 = vlog2.f32 %v1641_v2  ;;  %v1645_v14 = vadd.f32 1.0, %v1644_v20  ;;  %vm1648_vm12 = vcmp.lt.f32.partialorder %v1647_v13, 0.0004427343 }
 0x27f   : > { %v1640_v40 = vsel %vm1639_vm9, %v1637_v61, %v1634_v17 }
 0x280   : > { %v1672_v53 = vmul.f32 0.01, %v1640_v40  ;;  %v1646_v27 = vmul.f32 %v2359_v44, %v1645_v14 }
 0x282   : > { %v1688_v16 = vsel %vm1464_vm11, %v2992_v30, %v1672_v53 }
 0x283   : > { %v2363_v29 = vpop.eup %2362  ;;  %v1697_v42 = vpack.c.bf16 %v1688_v16, %v1687_v23 }
 0x284   : > { %v2365_v1 = vpop.eup %2364  ;;  %v1650_v36 = vadd.f32 1.0, %v2363_v29  ;;  %v1653_v48 = vmul.f32 -0.5, %v2363_v29  ;;  %v1656_v7 = vand.u32 2147483647, %v2363_v29 }
 0x285   : > { %1805 = vmatmul.bf16.gmra.mxu0 %v1697_v42  ;;  %v1643_v34 = vmul.f32 0.6931472, %v2365_v1 }
 0x286   : > { %2366 = vlog2.f32 %v1650_v36  ;;  %v1654_v37 = vadd.f32 1.0, %v1653_v48  ;;  %vm1657_vm13 = vcmp.lt.f32.partialorder %v1656_v7, 0.0004427343 }
 0x287   : > { %v1649_v10 = vsel %vm1648_vm12, %v1646_v27, %v1643_v34 }
 0x288   : > { %v1655_v6 = vmul.f32 %v2363_v29, %v1654_v37  ;;  %v1673_v30 = vmul.f32 0.01, %v1649_v10 }
 0x28a   : > { %v1689_v35 = vsel %vm1465_vm14, %v2999_v39, %v1673_v30 }
 0x28c   : > { %v2367_v24 = vpop.eup %2366 }
 0x28d   : > { %v1652_v12 = vmul.f32 0.6931472, %v2367_v24 }
 0x28f   : > { %v1658_v11 = vsel %vm1657_vm13, %v1655_v6, %v1652_v12 }
 0x290   : > { %v1674_v9 = vmul.f32 0.01, %v1658_v11 }
 0x292   : > { %v1690_v57 = vsel %vm1466_vm15, %v1434_v15, %v1674_v9 }
 0x293   : > { %v1698_v22 = vpack.c.bf16 %v1690_v57, %v1689_v35 }
 0x295   : > { %1810 = vmatmul.bf16.gmra.mxu0 %v1698_v22 }
 0x2a2   : > { %v1776_v33 = vpop.f32.mrf.mxu0 }
 0x2a3   : > { %v1777_v39 = vadd.f32 %v2175_v8, %v1776_v33 }
 0x2a5   : > { %1817 = vst.msk [vmem:[%s3023_s22] sm:$0xff] %vm1816_vm0, %v1777_v39 }
 0x2aa   : > { %v1778_v46 = vpop.f32.mrf.mxu0 }
 0x2ab   : > { %v1779_v49 = vadd.f32 %v2175_v8, %v1778_v46 }
 0x2ad   : > { %1818 = vst.msk [vmem:[%s3023_s22 + $0x8] sm:$0xff] %vm1816_vm0, %v1779_v49 }
 0x2b2   : > { %v1781_v54 = vpop.f32.mrf.mxu0 }
 0x2b3   : > { %v1782_v56 = vadd.f32 %v2175_v8, %v1781_v54 }
 0x2b5   : > { %1819 = vst.msk [vmem:[%s3023_s22 + $0x10] sm:$0xff] %vm1816_vm0, %v1782_v56 }
 0x2ba   : > { %v1783_v60 = vpop.f32.mrf.mxu0 }
 0x2bb   : > { %v1784_v25 = vadd.f32 %v2175_v8, %v1783_v60 }
 0x2bd   : > { %1820 = vst.msk [vmem:[%s3023_s22 + $0x18] sm:$0xff] %vm1816_vm0, %v1784_v25 }
 0x2c2   : > { %v1786_v3 = vpop.f32.mrf.mxu0 }
 0x2c3   : > { %v1787_v50 = vadd.f32 %v2175_v8, %v1786_v3 }
 0x2c5   : > { %1821 = vst.msk [vmem:[%s3023_s22 + $0x20] sm:$0xff] %vm1816_vm0, %v1787_v50 }
 0x2ca   : > { %v1788_v32 = vpop.f32.mrf.mxu0 }
 0x2cb   : > { %v1789_v52 = vadd.f32 %v2175_v8, %v1788_v32 }
 0x2cd   : > { %1822 = vst.msk [vmem:[%s3023_s22 + $0x28] sm:$0xff] %vm1816_vm0, %v1789_v52 }
 0x2d2   : > { %v1791_v62 = vpop.f32.mrf.mxu0 }
 0x2d3   : > { %v1792_v0 = vadd.f32 %v2175_v8, %v1791_v62 }
 0x2d5   : > { %1823 = vst.msk [vmem:[%s3023_s22 + $0x30] sm:$0xff] %vm1816_vm0, %v1792_v0 }
 0x2da   : > { %v1793_v45 = vpop.f32.mrf.mxu0 }
 0x2db   : > { %v1794_v41 = vadd.f32 %v2175_v8, %v1793_v45 }
 0x2dd   : > { %1824 = vst.msk [vmem:[%s3023_s22 + $0x38] sm:$0xff] %vm1816_vm0, %v1794_v41 }
 0x2e2   : > { %v1796_v4 = vpop.f32.mrf.mxu0 }
 0x2e3   : > { %v1797_v51 = vadd.f32 %v2175_v8, %v1796_v4 }
 0x2e5   : > { %1825 = vst.msk [vmem:[%s3023_s22 + $0x40] sm:$0xff] %vm1816_vm0, %v1797_v51 }
 0x2ea   : > { %v1798_v5 = vpop.f32.mrf.mxu0 }
 0x2eb   : > { %v1799_v15 = vadd.f32 %v2175_v8, %v1798_v5 }
 0x2ed   : > { %1826 = vst.msk [vmem:[%s3023_s22 + $0x48] sm:$0xff] %vm1816_vm0, %v1799_v15 }
 0x2f2   : > { %v1801_v18 = vpop.f32.mrf.mxu0 }
 0x2f3   : > { %v1802_v47 = vadd.f32 %v2175_v8, %v1801_v18 }
 0x2f5   : > { %1827 = vst.msk [vmem:[%s3023_s22 + $0x50] sm:$0xff] %vm1816_vm0, %v1802_v47 }
 0x2fa   : > { %v1803_v58 = vpop.f32.mrf.mxu0 }
 0x2fb   : > { %v1804_v31 = vadd.f32 %v2175_v8, %v1803_v58 }
 0x2fd   : > { %1828 = vst.msk [vmem:[%s3023_s22 + $0x58] sm:$0xff] %vm1816_vm0, %v1804_v31 }
 0x302   : > { %v1806_v21 = vpop.f32.mrf.mxu0 }
 0x303   : > { %v1807_v55 = vadd.f32 %v2175_v8, %v1806_v21 }
 0x305   : > { %1829 = vst.msk [vmem:[%s3023_s22 + $0x60] sm:$0xff] %vm1816_vm0, %v1807_v55 }
 0x30a   : > { %v1808_v26 = vpop.f32.mrf.mxu0 }
 0x30b   : > { %v1809_v43 = vadd.f32 %v2175_v8, %v1808_v26 }
 0x30d   : > { %1830 = vst.msk [vmem:[%s3023_s22 + $0x68] sm:$0xff] %vm1816_vm0, %v1809_v43 }
 0x312   : > { %v1811_v19 = vpop.f32.mrf.mxu0 }
 0x313   : > { %v1812_v44 = vadd.f32 %v2175_v8, %v1811_v19 }
 0x315   : > { %1831 = vst.msk [vmem:[%s3023_s22 + $0x70] sm:$0xff] %vm1816_vm0, %v1812_v44 }
 0x31a   : > { %v1813_v63 = vpop.f32.mrf.mxu0 }
 0x31b   : > { %v1814_v38 = vadd.f32 %v2175_v8, %v1813_v63 }
 0x31d   : > { %1832 = vst.msk [vmem:[%s3023_s22 + $0x78] sm:$0xff] %vm1816_vm0, %v1814_v38 }
 0x31e PF: > { %s20_s13 = sadd.s32 1, %s2379_s13  }
 0x31f   : > { %p17_p4 = scmp.ge.s32.totalorder %s20_s13, 4  }
 0x321   :  { %19 = sbr.rel (!%p17_p4) target bundleno = 1 (0x1), region = 90 }

</bundles_post_ra>
